<compile_context>
chip_gen: v5e
topology: v5e:2x2
jax: 0.10.0
libtpu: 0.0.40
codegen_flags: <defaults>
</compile_context>

<pallas_src>
import functools
import math

import jax
import jax.numpy as jnp
from jax.experimental import pallas as pl
from jax.experimental.pallas import tpu as pltpu


def _round_up(x, m):
    return ((x + m - 1) // m) * m


def _attn_kernel(*refs, scale, has_bias, write_attn):
    idx = 0
    q_ref = refs[idx]; idx += 1
    kT_ref = refs[idx]; idx += 1
    v_ref = refs[idx]; idx += 1
    b_ref = None
    if has_bias:
        b_ref = refs[idx]; idx += 1
    o_ref = refs[idx]; idx += 1
    a_ref = refs[idx] if write_attn else None

    # (q / temperature) in the input dtype, then cast to the matmul dtype so the
    # MXU sees bf16 operands when requested (f32 accumulation either way).
    q = (q_ref[...] * jnp.asarray(scale, dtype=q_ref.dtype)).astype(kT_ref.dtype)

    # scores = q @ K^T with K pre-transposed in the wrapper: plain NN matmul,
    # lane-dense along Lk_pad, no per-tile transpose of the resident K block.
    scores = jnp.dot(q, kT_ref[...], preferred_element_type=jnp.float32)

    if has_bias:
        # Additive bias: 0 where attended, -1e9 where mask==0 or padded K column.
        # (For a row that is *entirely* masked this differs from masked_fill:
        # softmax(scores - 1e9) == softmax(scores) rather than uniform; both are
        # degenerate outputs.)
        scores = scores + b_ref[...].astype(jnp.float32)

    # Row-exact, numerically stable softmax (f32 intermediates only).
    m = jnp.max(scores, axis=-1, keepdims=True)
    e = jnp.exp(scores - m)
    denom = jnp.sum(e, axis=-1, keepdims=True)
    # EUP approx reciprocal + one Newton step on the (tq, 1) column: ~free and
    # recovers full f32 accuracy so rows sum to 1 like torch.softmax.
    r = pl.reciprocal(denom, approx=True)
    r = r * (jnp.float32(2.0) - denom * r)
    attn = e * r

    # TODO(synk): nn.Dropout(0.1) is identity in eval mode; training-mode dropout
    # (pltpu.prng_seed + pltpu.stateful_bernoulli on attn) intentionally omitted.

    if write_attn:
        a_ref[...] = attn.astype(a_ref.dtype)

    # output = attn @ v ; feed MXU in V's dtype, f32 accumulate.
    out = jnp.dot(attn.astype(v_ref.dtype), v_ref[...],
                  preferred_element_type=jnp.float32)
    o_ref[...] = out.astype(o_ref.dtype)


def scaled_dot_product_attention(q, k, v, temperature, mask=None, *,
                                 block_q=128, return_attn=True,
                                 attn_dtype=None, use_bf16_matmul=False):
    """q: [Lq, D], k: [Lk, D], v: [Lk, Dv] -> (output [Lq, Dv], attn [Lq, Lk] | None).

    mask may be None, [Lq, Lk], [1, Lk] or [Lk]; nonzero = attend (PyTorch
    masked_fill(mask == 0, -1e9) semantics).
    """
    Lq, D = q.shape
    Lk, Dk = k.shape
    assert D == Dk, "q and k feature dims must match"
    Lkv, Dv = v.shape
    assert Lkv == Lk, "k and v sequence lengths must match"

    in_dtype = q.dtype
    mm_dtype = jnp.bfloat16 if (use_bf16_matmul and in_dtype == jnp.float32) else in_dtype
    attn_out_dtype = jnp.dtype(attn_dtype) if attn_dtype is not None else in_dtype

    # Lane-dense scores / attn: pad Lk to a multiple of 128.
    Lk_pad = _round_up(Lk, 128)

    # Query tiling: minimize ragged padding and keep >=2 grid steps when
    # possible so megacore ("parallel") sharding has work for both cores.
    n_tiles = max(pl.cdiv(Lq, block_q), 2 if Lq >= 16 else 1)
    tq = _round_up(pl.cdiv(Lq, n_tiles), 8)

    # VMEM-budget-aware shrink of tq (v7x: 64 MiB/TC; v5e: 16 MiB scoped default).
    def vmem_est(tq_):
        mm_b = jnp.dtype(mm_dtype).itemsize
        in_b = jnp.dtype(in_dtype).itemsize
        resident = (D * Lk_pad + Lk_pad * Dv) * mm_b + Lk_pad * 2   # K^T, V, key bias
        per_tile = tq_ * D * in_b + tq_ * Dv * in_b                  # q in, out
        if return_attn:
            per_tile += tq_ * Lk_pad * jnp.dtype(attn_out_dtype).itemsize
        if mask is not None:
            per_tile += tq_ * Lk_pad * 2                             # bf16 bias tile
        scratch = 3 * tq_ * Lk_pad * 4                               # f32 softmax temps
        return resident + 2 * per_tile + scratch                     # 2x: double-buffer

    VMEM_BUDGET = 24 * 1024 * 1024
    while tq > 8 and vmem_est(tq) > VMEM_BUDGET:
        tq = max(8, _round_up(tq // 2, 8))

    Lq_pad = _round_up(Lq, tq)
    grid = (Lq_pad // tq,)

    qp = jnp.pad(q, ((0, Lq_pad - Lq), (0, 0))) if Lq_pad != Lq else q
    # K pre-transposed once: [D, Lk_pad]; padded keys are zero and receive a
    # -1e9 additive bias, so they never get attention weight.
    kpad = jnp.pad(k, ((0, Lk_pad - Lk), (0, 0))) if Lk_pad != Lk else k
    kT = kpad.T.astype(mm_dtype)
    vp = (jnp.pad(v, ((0, Lk_pad - Lk), (0, 0))) if Lk_pad != Lk else v).astype(mm_dtype)

    # ---- additive bias (bf16) replacing the int32 mask + iota column mask ----
    NEG = jnp.float32(-1e9)   # same constant as the PyTorch module
    bias = None
    bias_rows = 0
    if mask is not None:
        mvalid = jnp.asarray(mask) != 0
        key_only = (mvalid.ndim == 1) or (mvalid.ndim == 2 and mvalid.shape[0] == 1)
        if key_only:
            row = mvalid.reshape(1, -1)
            b = jnp.where(row, jnp.float32(0.0), NEG).astype(jnp.bfloat16)
            bias = jnp.pad(b, ((0, 0), (0, Lk_pad - Lk)), constant_values=-1e9)
            bias_rows = 1
        else:
            full = jnp.broadcast_to(mvalid, (Lq, Lk))
            b = jnp.where(full, jnp.float32(0.0), NEG).astype(jnp.bfloat16)
            bias = jnp.pad(b, ((0, Lq_pad - Lq), (0, Lk_pad - Lk)),
                           constant_values=-1e9)
            bias_rows = tq
    elif Lk_pad != Lk:
        bias = jnp.pad(jnp.zeros((1, Lk), jnp.bfloat16),
                       ((0, 0), (0, Lk_pad - Lk)), constant_values=-1e9)
        bias_rows = 1
    has_bias = bias is not None

    def call_kernel(single_buffer_resident):
        res_kwargs = {"pipeline_mode": pl.Buffered(1)} if single_buffer_resident else {}

        inputs = [qp, kT, vp]
        in_specs = [
            pl.BlockSpec((tq, D), lambda i: (i, 0)),                     # q: tiled over Lq
            pl.BlockSpec((D, Lk_pad), lambda i: (0, 0), **res_kwargs),   # K^T: whole-resident
            pl.BlockSpec((Lk_pad, Dv), lambda i: (0, 0), **res_kwargs),  # V : whole-resident
        ]
        if has_bias:
            inputs.append(bias)
            if bias_rows == 1:
                in_specs.append(pl.BlockSpec((1, Lk_pad), lambda i: (0, 0), **res_kwargs))
            else:
                in_specs.append(pl.BlockSpec((tq, Lk_pad), lambda i: (i, 0)))

        out_shape = [jax.ShapeDtypeStruct((Lq_pad, Dv), in_dtype)]
        out_specs = [pl.BlockSpec((tq, Dv), lambda i: (i, 0))]
        if return_attn:
            out_shape.append(jax.ShapeDtypeStruct((Lq_pad, Lk_pad), attn_out_dtype))
            out_specs.append(pl.BlockSpec((tq, Lk_pad), lambda i: (i, 0)))

        kernel = functools.partial(
            _attn_kernel,
            scale=1.0 / float(temperature),
            has_bias=has_bias,
            write_attn=return_attn)

        bytes_in = sum(int(x.size) * x.dtype.itemsize for x in inputs)
        bytes_out = sum(math.prod(s.shape) * jnp.dtype(s.dtype).itemsize
                        for s in out_shape)
        cost = pl.CostEstimate(
            flops=2 * Lq_pad * Lk_pad * (D + Dv),
            transcendentals=Lq_pad * Lk_pad,
            bytes_accessed=int(bytes_in + bytes_out))

        vmem_limit = int(min(64 * 1024 * 1024,
                             max(32 * 1024 * 1024, 2 * vmem_est(tq))))

        return pl.pallas_call(
            kernel,
            out_shape=tuple(out_shape),
            grid=grid,
            in_specs=in_specs,
            out_specs=out_specs,
            compiler_params=pltpu.CompilerParams(
                dimension_semantics=("parallel",),   # megacore-shard Lq tiles
                vmem_limit_bytes=vmem_limit),
            cost_estimate=cost,
        )(*inputs)

    try:
        res = call_kernel(True)
    except Exception:
        # Fallback if this Pallas version rejects single-buffered (Buffered(1))
        # grid-invariant blocks: default double-buffering, same semantics.
        res = call_kernel(False)

    if return_attn:
        out_p, attn_p = res[0], res[1]
        return out_p[:Lq], attn_p[:Lq, :Lk]
    return res[0][:Lq], None


def _reference(q, k, v, temperature, mask=None):
    scores = jnp.matmul(q / temperature, k.T)
    if mask is not None:
        m = jnp.broadcast_to(jnp.asarray(mask) != 0, scores.shape)
        scores = jnp.where(m, scores, jnp.float32(-1e9))
    attn = jax.nn.softmax(scores, axis=-1)
    return jnp.matmul(attn, v), attn


if __name__ == "__main__":
    key = jax.random.PRNGKey(0)
    kq, kk, kv, km, km2 = jax.random.split(key, 5)

    # Small but non-trivial shapes: exercises ragged Lq tiling (300 -> 3 tiles
    # of 104) and Lk padding (192 -> 256).
    Lq, Lk, D, Dv = 300, 192, 64, 64
    temperature = float(D) ** 0.5

    q = jax.random.normal(kq, (Lq, D), dtype=jnp.float32)
    k = jax.random.normal(kk, (Lk, D), dtype=jnp.float32)
    v = jax.random.normal(kv, (Lk, Dv), dtype=jnp.float32)

    # --- no-mask path ---
    out, attn = scaled_dot_product_attention(q, k, v, temperature)
    out, attn = jax.block_until_ready((out, attn))
    ref_out, ref_attn = _reference(q, k, v, temperature)
    assert out.shape == (Lq, Dv) and attn.shape == (Lq, Lk)
    assert jnp.allclose(out, ref_out, atol=2e-3, rtol=2e-3), "output mismatch"
    assert jnp.allclose(attn, ref_attn, atol=2e-3, rtol=2e-3), "attn mismatch"

    # --- full [Lq, Lk] mask (PyTorch masked_fill(mask == 0, -1e9)) ---
    mask = (jax.random.uniform(km, (Lq, Lk)) > 0.3).astype(jnp.int32)
    mask = mask.at[:, 0].set(1)  # avoid fully-masked rows
    out_m, attn_m = scaled_dot_product_attention(q, k, v, temperature, mask=mask)
    out_m, attn_m = jax.block_until_ready((out_m, attn_m))
    ref_out_m, ref_attn_m = _reference(q, k, v, temperature, mask=mask)
    assert jnp.allclose(out_m, ref_out_m, atol=2e-3, rtol=2e-3), "masked output mismatch"
    assert jnp.allclose(attn_m, ref_attn_m, atol=2e-3, rtol=2e-3), "masked attn mismatch"

    # --- key-only mask ([Lk]); stays a grid-invariant (1, Lk_pad) bias row ---
    kmask = (jax.random.uniform(km2, (Lk,)) > 0.25).astype(jnp.int32)
    kmask = kmask.at[0].set(1)
    out_k, attn_k = scaled_dot_product_attention(q, k, v, temperature, mask=kmask)
    out_k, attn_k = jax.block_until_ready((out_k, attn_k))
    ref_out_k, ref_attn_k = _reference(q, k, v, temperature, mask=kmask)
    assert jnp.allclose(out_k, ref_out_k, atol=2e-3, rtol=2e-3), "key-mask output mismatch"
    assert jnp.allclose(attn_k, ref_attn_k, atol=2e-3, rtol=2e-3), "key-mask attn mismatch"

    # --- output-only path (skips the [Lq, Lk] attn HBM writeback) ---
    out_no, attn_no = scaled_dot_product_attention(q, k, v, temperature,
                                                   return_attn=False)
    out_no = jax.block_until_ready(out_no)
    assert attn_no is None
    assert jnp.allclose(out_no, ref_out, atol=2e-3, rtol=2e-3), "no-attn output mismatch"

    # --- bf16-MXU path (f32 inputs, bf16 matmul operands, f32 accumulation) ---
    out_b, attn_b = scaled_dot_product_attention(q, k, v, temperature,
                                                 use_bf16_matmul=True)
    out_b, attn_b = jax.block_until_ready((out_b, attn_b))
    assert jnp.allclose(out_b, ref_out, atol=3e-2, rtol=3e-2), "bf16 output mismatch"
    assert jnp.allclose(attn_b, ref_attn, atol=3e-2, rtol=3e-2), "bf16 attn mismatch"

    print("KERNEL_OK")
</pallas_src>

<mosaic_0001>
module attributes {stable_mosaic.version = 11 : i64} {
  func.func @_attn_kernel(%arg0: i32, %arg1: memref<104x64xf32, #tpu.memory_space<vmem>>, %arg2: memref<64x256xf32, #tpu.memory_space<vmem>>, %arg3: memref<256x64xf32, #tpu.memory_space<vmem>>, %arg4: memref<1x256xbf16, #tpu.memory_space<vmem>>, %arg5: memref<104x64xf32, #tpu.memory_space<vmem>>, %arg6: memref<104x256xf32, #tpu.memory_space<vmem>>) attributes {dimension_semantics = [#tpu.dimension_semantics<parallel>], iteration_bounds = array<i64: 3>, scalar_prefetch = 0 : i64, scratch_operands = 0 : i64, tpu.core_type = #tpu.core_type<tc>, window_params = [{transform_indices = @transform_0, window_bounds = array<i64: 104, 64>}, {pipeline_mode = #tpu.pipeline_mode<synchronous>, transform_indices = @transform_1, window_bounds = array<i64: 64, 256>}, {pipeline_mode = #tpu.pipeline_mode<synchronous>, transform_indices = @transform_2, window_bounds = array<i64: 256, 64>}, {pipeline_mode = #tpu.pipeline_mode<synchronous>, transform_indices = @transform_3, window_bounds = array<i64: 1, 256>}, {transform_indices = @transform_4, window_bounds = array<i64: 104, 64>}, {transform_indices = @transform_5, window_bounds = array<i64: 104, 256>}]} {
    %c0 = arith.constant 0 : index
    %c0_0 = arith.constant 0 : index
    %0 = vector.load %arg1[%c0, %c0_0] : memref<104x64xf32, #tpu.memory_space<vmem>>, vector<104x64xf32>
    %cst = arith.constant 1.250000e-01 : f32
    %1 = vector.broadcast %cst : f32 to vector<104x64xf32>
    %2 = arith.mulf %0, %1 : vector<104x64xf32>
    %c0_1 = arith.constant 0 : index
    %c0_2 = arith.constant 0 : index
    %3 = vector.load %arg2[%c0_1, %c0_2] : memref<64x256xf32, #tpu.memory_space<vmem>>, vector<64x256xf32>
    %cst_3 = arith.constant dense<0.000000e+00> : vector<104x256xf32>
    %4 = tpu.matmul %2, %3, %cst_3 {dimension_numbers = #tpu.dot_dimension_numbers<[1], [0], [0], [1], [0, 0, 1, 1], [], []>} : vector<104x64xf32>, vector<64x256xf32>, vector<104x256xf32> -> vector<104x256xf32>
    %c0_4 = arith.constant 0 : index
    %c0_5 = arith.constant 0 : index
    %5 = vector.load %arg4[%c0_4, %c0_5] : memref<1x256xbf16, #tpu.memory_space<vmem>>, vector<1x256xbf16>
    %6 = arith.extf %5 : vector<1x256xbf16> to vector<1x256xf32>
    %7 = vector.broadcast %6 : vector<1x256xf32> to vector<104x256xf32>
    %8 = arith.addf %4, %7 : vector<104x256xf32>
    %cst_6 = arith.constant dense<0xFF800000> : vector<104xf32>
    %9 = vector.multi_reduction <maximumf>, %8, %cst_6 [1] : vector<104x256xf32> to vector<104xf32>
    %10 = vector.shape_cast %9 : vector<104xf32> to vector<104x1xf32>
    %11 = vector.broadcast %10 : vector<104x1xf32> to vector<104x256xf32>
    %12 = arith.subf %8, %11 : vector<104x256xf32>
    %13 = math.exp %12 : vector<104x256xf32>
    %cst_7 = arith.constant dense<0.000000e+00> : vector<104xf32>
    %14 = vector.multi_reduction <add>, %13, %cst_7 [1] : vector<104x256xf32> to vector<104xf32>
    %15 = vector.shape_cast %14 : vector<104xf32> to vector<104x1xf32>
    %16 = tpu.reciprocal %15 {approx = true} : vector<104x1xf32> -> vector<104x1xf32>
    %17 = arith.mulf %15, %16 : vector<104x1xf32>
    %cst_8 = arith.constant 2.000000e+00 : f32
    %18 = vector.broadcast %cst_8 : f32 to vector<104x1xf32>
    %19 = arith.subf %18, %17 : vector<104x1xf32>
    %20 = arith.mulf %16, %19 : vector<104x1xf32>
    %21 = vector.broadcast %20 : vector<104x1xf32> to vector<104x256xf32>
    %22 = arith.mulf %13, %21 : vector<104x256xf32>
    %c0_9 = arith.constant 0 : index
    %c0_10 = arith.constant 0 : index
    %23 = vector.load %arg6[%c0_9, %c0_10] : memref<104x256xf32, #tpu.memory_space<vmem>>, vector<104x256xf32>
    tpu.vector_store %arg6[%c0_9, %c0_10], %22 {strides = array<i32>} : memref<104x256xf32, #tpu.memory_space<vmem>>, vector<104x256xf32>,
    %c0_11 = arith.constant 0 : index
    %c0_12 = arith.constant 0 : index
    %24 = vector.load %arg3[%c0_11, %c0_12] : memref<256x64xf32, #tpu.memory_space<vmem>>, vector<256x64xf32>
    %cst_13 = arith.constant dense<0.000000e+00> : vector<104x64xf32>
    %25 = tpu.matmul %22, %24, %cst_13 {dimension_numbers = #tpu.dot_dimension_numbers<[1], [0], [0], [1], [0, 0, 1, 1], [], []>} : vector<104x256xf32>, vector<256x64xf32>, vector<104x64xf32> -> vector<104x64xf32>
    %c0_14 = arith.constant 0 : index
    %c0_15 = arith.constant 0 : index
    %26 = vector.load %arg5[%c0_14, %c0_15] : memref<104x64xf32, #tpu.memory_space<vmem>>, vector<104x64xf32>
    tpu.vector_store %arg5[%c0_14, %c0_15], %25 {strides = array<i32>} : memref<104x64xf32, #tpu.memory_space<vmem>>, vector<104x64xf32>,
    return
  }
  func.func @transform_0(%arg0: i32) -> (i32, i32) {
    %c0_i32 = arith.constant 0 : i32
    %c0_i32_0 = arith.constant 0 : i32
    return %arg0, %c0_i32 : i32, i32
  }
  func.func @transform_1(%arg0: i32) -> (i32, i32) {
    %c0_i32 = arith.constant 0 : i32
    %c0_i32_0 = arith.constant 0 : i32
    %c0_i32_1 = arith.constant 0 : i32
    return %c0_i32, %c0_i32_0 : i32, i32
  }
  func.func @transform_2(%arg0: i32) -> (i32, i32) {
    %c0_i32 = arith.constant 0 : i32
    %c0_i32_0 = arith.constant 0 : i32
    %c0_i32_1 = arith.constant 0 : i32
    return %c0_i32, %c0_i32_0 : i32, i32
  }
  func.func @transform_3(%arg0: i32) -> (i32, i32) {
    %c0_i32 = arith.constant 0 : i32
    %c0_i32_0 = arith.constant 0 : i32
    %c0_i32_1 = arith.constant 0 : i32
    return %c0_i32, %c0_i32_0 : i32, i32
  }
  func.func @transform_4(%arg0: i32) -> (i32, i32) {
    %c0_i32 = arith.constant 0 : i32
    %c0_i32_0 = arith.constant 0 : i32
    return %arg0, %c0_i32 : i32, i32
  }
  func.func @transform_5(%arg0: i32) -> (i32, i32) {
    %c0_i32 = arith.constant 0 : i32
    %c0_i32_0 = arith.constant 0 : i32
    return %arg0, %c0_i32 : i32, i32
  }
}

module attributes {stable_mosaic.version = 11 : i64} {
  func.func @_attn_kernel(%arg0: i32, %arg1: memref<104x64xf32, #tpu.memory_space<vmem>>, %arg2: memref<64x256xf32, #tpu.memory_space<vmem>>, %arg3: memref<256x64xf32, #tpu.memory_space<vmem>>, %arg4: memref<1x256xbf16, #tpu.memory_space<vmem>>, %arg5: memref<104x64xf32, #tpu.memory_space<vmem>>, %arg6: memref<104x256xf32, #tpu.memory_space<vmem>>) attributes {dimension_semantics = [#tpu.dimension_semantics<parallel>], iteration_bounds = array<i64: 3>, scalar_prefetch = 0 : i64, scratch_operands = 0 : i64, tpu.core_type = #tpu.core_type<tc>, window_params = [{transform_indices = @transform_0, window_bounds = array<i64: 104, 64>}, {pipeline_mode = #tpu.pipeline_mode<synchronous>, transform_indices = @transform_1, window_bounds = array<i64: 64, 256>}, {pipeline_mode = #tpu.pipeline_mode<synchronous>, transform_indices = @transform_2, window_bounds = array<i64: 256, 64>}, {pipeline_mode = #tpu.pipeline_mode<synchronous>, transform_indices = @transform_3, window_bounds = array<i64: 1, 256>}, {transform_indices = @transform_4, window_bounds = array<i64: 104, 64>}, {transform_indices = @transform_5, window_bounds = array<i64: 104, 256>}]} {
    %c0 = arith.constant 0 : index
    %c0_0 = arith.constant 0 : index
    %0 = vector.load %arg1[%c0, %c0_0] : memref<104x64xf32, #tpu.memory_space<vmem>>, vector<104x64xf32>
    %cst = arith.constant 1.250000e-01 : f32
    %1 = vector.broadcast %cst : f32 to vector<104x64xf32>
    %2 = arith.mulf %0, %1 : vector<104x64xf32>
    %c0_1 = arith.constant 0 : index
    %c0_2 = arith.constant 0 : index
    %3 = vector.load %arg2[%c0_1, %c0_2] : memref<64x256xf32, #tpu.memory_space<vmem>>, vector<64x256xf32>
    %cst_3 = arith.constant dense<0.000000e+00> : vector<104x256xf32>
    %4 = tpu.matmul %2, %3, %cst_3 {dimension_numbers = #tpu.dot_dimension_numbers<[1], [0], [0], [1], [0, 0, 1, 1], [], []>} : vector<104x64xf32>, vector<64x256xf32>, vector<104x256xf32> -> vector<104x256xf32>
    %c0_4 = arith.constant 0 : index
    %c0_5 = arith.constant 0 : index
    %5 = vector.load %arg4[%c0_4, %c0_5] : memref<1x256xbf16, #tpu.memory_space<vmem>>, vector<1x256xbf16>
    %6 = arith.extf %5 : vector<1x256xbf16> to vector<1x256xf32>
    %7 = vector.broadcast %6 : vector<1x256xf32> to vector<104x256xf32>
    %8 = arith.addf %4, %7 : vector<104x256xf32>
    %cst_6 = arith.constant dense<0xFF800000> : vector<104xf32>
    %9 = vector.multi_reduction <maximumf>, %8, %cst_6 [1] : vector<104x256xf32> to vector<104xf32>
    %10 = vector.shape_cast %9 : vector<104xf32> to vector<104x1xf32>
    %11 = vector.broadcast %10 : vector<104x1xf32> to vector<104x256xf32>
    %12 = arith.subf %8, %11 : vector<104x256xf32>
    %13 = math.exp %12 : vector<104x256xf32>
    %cst_7 = arith.constant dense<0.000000e+00> : vector<104xf32>
    %14 = vector.multi_reduction <add>, %13, %cst_7 [1] : vector<104x256xf32> to vector<104xf32>
    %15 = vector.shape_cast %14 : vector<104xf32> to vector<104x1xf32>
    %16 = tpu.reciprocal %15 {approx = true} : vector<104x1xf32> -> vector<104x1xf32>
    %17 = arith.mulf %15, %16 : vector<104x1xf32>
    %cst_8 = arith.constant 2.000000e+00 : f32
    %18 = vector.broadcast %cst_8 : f32 to vector<104x1xf32>
    %19 = arith.subf %18, %17 : vector<104x1xf32>
    %20 = arith.mulf %16, %19 : vector<104x1xf32>
    %21 = vector.broadcast %20 : vector<104x1xf32> to vector<104x256xf32>
    %22 = arith.mulf %13, %21 : vector<104x256xf32>
    %c0_9 = arith.constant 0 : index
    %c0_10 = arith.constant 0 : index
    %23 = vector.load %arg6[%c0_9, %c0_10] : memref<104x256xf32, #tpu.memory_space<vmem>>, vector<104x256xf32>
    tpu.vector_store %arg6[%c0_9, %c0_10], %22 {strides = array<i32>} : memref<104x256xf32, #tpu.memory_space<vmem>>, vector<104x256xf32>,
    %c0_11 = arith.constant 0 : index
    %c0_12 = arith.constant 0 : index
    %24 = vector.load %arg3[%c0_11, %c0_12] : memref<256x64xf32, #tpu.memory_space<vmem>>, vector<256x64xf32>
    %cst_13 = arith.constant dense<0.000000e+00> : vector<104x64xf32>
    %25 = tpu.matmul %22, %24, %cst_13 {dimension_numbers = #tpu.dot_dimension_numbers<[1], [0], [0], [1], [0, 0, 1, 1], [], []>} : vector<104x256xf32>, vector<256x64xf32>, vector<104x64xf32> -> vector<104x64xf32>
    %c0_14 = arith.constant 0 : index
    %c0_15 = arith.constant 0 : index
    %26 = vector.load %arg5[%c0_14, %c0_15] : memref<104x64xf32, #tpu.memory_space<vmem>>, vector<104x64xf32>
    tpu.vector_store %arg5[%c0_14, %c0_15], %25 {strides = array<i32>} : memref<104x64xf32, #tpu.memory_space<vmem>>, vector<104x64xf32>,
    return
  }
  func.func @transform_0(%arg0: i32) -> (i32, i32) {
    %c0_i32 = arith.constant 0 : i32
    %c0_i32_0 = arith.constant 0 : i32
    return %arg0, %c0_i32 : i32, i32
  }
  func.func @transform_1(%arg0: i32) -> (i32, i32) {
    %c0_i32 = arith.constant 0 : i32
    %c0_i32_0 = arith.constant 0 : i32
    %c0_i32_1 = arith.constant 0 : i32
    return %c0_i32, %c0_i32_0 : i32, i32
  }
  func.func @transform_2(%arg0: i32) -> (i32, i32) {
    %c0_i32 = arith.constant 0 : i32
    %c0_i32_0 = arith.constant 0 : i32
    %c0_i32_1 = arith.constant 0 : i32
    return %c0_i32, %c0_i32_0 : i32, i32
  }
  func.func @transform_3(%arg0: i32) -> (i32, i32) {
    %c0_i32 = arith.constant 0 : i32
    %c0_i32_0 = arith.constant 0 : i32
    %c0_i32_1 = arith.constant 0 : i32
    return %c0_i32, %c0_i32_0 : i32, i32
  }
  func.func @transform_4(%arg0: i32) -> (i32, i32) {
    %c0_i32 = arith.constant 0 : i32
    %c0_i32_0 = arith.constant 0 : i32
    return %arg0, %c0_i32 : i32, i32
  }
  func.func @transform_5(%arg0: i32) -> (i32, i32) {
    %c0_i32 = arith.constant 0 : i32
    %c0_i32_0 = arith.constant 0 : i32
    return %arg0, %c0_i32 : i32, i32
  }
}

</mosaic_0001>

<bundles_post_ra>
// kernel: tpu_custom_call.1
= control target key start
LH: loop header
LB: loop body
LE: loop exit
PB: predicated region body
PF: predicated region fallthrough
CT: control target
= control target key end

     0   :  { %11 = vsyncpa [#allocation3], 0  ;;  %s1823_s0 = inlined_call_operand.vmem [shape: f32[312,64], index: 0, kind: input, shape index: {}]   ;;  %s1824_s1 = inlined_call_operand.vmem [shape: f32[64,256], index: 1, kind: input, shape index: {}]   ;;  %s1825_s2 = inlined_call_operand.vmem [shape: f32[256,64], index: 2, kind: input, shape index: {}]   ;;  %s1826_s3 = inlined_call_operand.vmem [shape: bf16[1,256], index: 3, kind: input, shape index: {}]   ;;  %s1827_s4 = inlined_call_operand.vmem [shape: f32[312,64], index: 4, kind: output, shape index: {0}]   ;;  %s1828_s5 = inlined_call_operand.hbm [shape: f32[312,256], index: 5, kind: output, shape index: {1}]  }
   0x1   :  { %13 = vsyncpa [#allocation3 + $0x1], 0  ;;  %s1260_s18 = smov 0   ;;  %s1262_s19 = smov 0  }
   0x2   :  { %s1264_s20 = smov 0   ;;  %s1266_s21 = smov 0  }
   0x3 LB: > { %s1281_s22 = sadd.s32 4294967295, %s1226_s21   ;;  %s973_s23 = sadd.s32 4294967294, %s1226_s21   ;;  %s1226_s21 = sphi %s1266_s21, %s1834_s21   ;;  %s1222_s20 = sphi %s1264_s20, %s1833_s20   ;;  %s1218_s19 = sphi %s1262_s19, %s1832_s19   ;;  %s1214_s18 = sphi %s1260_s18, %s1831_s18  }
   0x4   : > { %s1285_s24 = sadd.s32 1, %s1226_s21   ;;  %s141_s25 = sadd.s32 1, %s1222_s20 }
   0x5   : > { %s138_s26 = ssub.s32 %s1226_s21, %s1285_s24  ;;  %p151_p0 = scmp.ne.s32.totalorder %s1222_s20, %s1218_s19 }
   0x6   : > { %p139_p1 = scmp.eq.s32.totalorder %s138_s26, 0  ;;  %p152_p2 = scmp.eq.s32.totalorder %s1281_s22, 2 }
   0x7   : > { %p157_p3 = scmp.ne.s32.totalorder %s1218_s19, %s1214_s18  ;;  %p158_p4 = scmp.eq.s32.totalorder %s973_s23, 2 }
   0x8   : > { %s1296_s27 = scalar_select %p139_p1, %s1222_s20, %s141_s25  }
   0x9   : > { %p1298_p5 = por %p152_p2, %p151_p0  ;;  %p1302_p6 = por %p158_p4, %p157_p3 }
   0xa   : > { %p976_p7 = scmp.ge.s32.totalorder %s1226_s21, 1  ;;  %p194_p8 = scmp.lt.s32.totalorder %s1226_s21, 4 }
   0xc   : > { %p195_p9 = pnand %p976_p7, %p194_p8 }
   0xd   : > { %s227_s11 = smul.u32 (!%p195_p9), 13, %s1281_s22  ;;  %s224_s7 = sand.u32 (!%p195_p9), 1, %s1218_s19  }
   0xe   : > { %198 = sbr.rel (%p195_p9) target bundleno = 733 (0x2dd), region = 36 }
   0xf   : > { %p228_p10 = scmp.lt.s32.totalorder (!%p195_p9), %s227_s11, 38  ;;  %s1044_s8 = smul.u32 (!%p195_p9), 208, %s224_s7 }
  0x11   : > { %s1666_s9 = scalar_lea.vmem (!%p195_p9), [#allocation2], %s1044_s8  ;;  %s1184_s8 = scalar_lea.hbm (!%p195_p9), %s1828_s5, 624 }
  0x12   : > { %s883_s17 = sshll.u32 (!%p195_p9), %s1666_s9, 4  ;;  %s884_s17 = int_to_ptr.vmem [resolvable:$true] %s883_s17 }
  0x13   : > { %v280_v0 = vld [vmem:[%s1824_s1 + $0x70] sm:$0xff]  ;;  %v281_v1 = vld [vmem:[%s1824_s1 + $0x78] sm:$0xff]  ;;  %v278_v2 = vld [vmem:[%s1824_s1 + $0x60] sm:$0xff]  ;;  %s1836_s11 = smov (!%p228_p10, %s227_s11), 38  ;;  %vm291_vm0 = vcmask 523264  }
  0x14   : > { %339 = vmatpush.msra.mxu0 %v280_v0  ;;  %395 = vmatpush.msra.mxu1 %v281_v1  ;;  %v279_v3 = vld [vmem:[%s1824_s1 + $0x68] sm:$0xff]  ;;  %v276_v4 = vld [vmem:[%s1824_s1 + $0x50] sm:$0xff]  ;;  %v277_v5 = vld [vmem:[%s1824_s1 + $0x58] sm:$0xff]  ;;  %s977_s10 = sshll.u32 %s1836_s11, 3  ;;  %s1011_s11 = smul.u32 208, %s1281_s22 }
  0x15   : > { %v274_v6 = vld [vmem:[%s1824_s1 + $0x40] sm:$0xff]  ;;  %v275_v7 = vld [vmem:[%s1824_s1 + $0x48] sm:$0xff]  ;;  %v272_v8 = vld [vmem:[%s1824_s1 + $0x30] sm:$0xff]  ;;  %s1347_s14 = scalar_lea.vmem %s1823_s0, %s977_s10  ;;  %s1741_s15 = scalar_lea.vmem %s1827_s4, %s977_s10 }
  0x16   : > { %340 = vmatpush.msra.mxu0 %v278_v2  ;;  %396 = vmatpush.msra.mxu1 %v279_v3  ;;  %v273_v9 = vld [vmem:[%s1824_s1 + $0x38] sm:$0xff]  ;;  %v270_v10 = vld [vmem:[%s1824_s1 + $0x20] sm:$0xff]  ;;  %v271_v11 = vld [vmem:[%s1824_s1 + $0x28] sm:$0xff]  ;;  %s882_s16 = scalar_lea.hbm %s1828_s5, %s1011_s11  ;;  %s866_s22 = scalar_lea.sflag [#allocation3], %s224_s7 }
  0x17   : > { %v240_v12 = vld [vmem:[%s1347_s14] sm:$0xff]  ;;  %v268_v13 = vld [vmem:[%s1824_s1 + $0x10] sm:$0xff]  ;;  %v269_v14 = vld [vmem:[%s1824_s1 + $0x18] sm:$0xff]  ;;  %s885_s23 = sshll.u32 %s882_s16, 4  ;;  %s886_s23 = int_to_ptr.hbm [resolvable:$true] %s885_s23 }
  0x18   : > { %341 = vmatpush.msra.mxu0 %v276_v4  ;;  %397 = vmatpush.msra.mxu1 %v277_v5  ;;  %v266_v15 = vld [vmem:[%s1824_s1] sm:$0xff]  ;;  %v267_v16 = vld [vmem:[%s1824_s1 + $0x8] sm:$0xff]  ;;  %v253_v17 = vmul.f32 0.125, %v240_v12  ;;  %v242_v20 = vld [vmem:[%s1347_s14 + $0x10] sm:$0xff]  ;;  %s1178_s25 = sshra.s32 %s886_s23, 4  ;;  %s1179_s25 = int_to_ptr.hbm [resolvable:$true] %s1178_s25 }
  0x19   : > { %v241_v18 = vld [vmem:[%s1347_s14 + $0x8] sm:$0xff]  ;;  %v255_v21 = vmul.f32 0.125, %v242_v20  ;;  %v243_v22 = vld [vmem:[%s1347_s14 + $0x18] sm:$0xff]  ;;  %v244_v24 = vld [vmem:[%s1347_s14 + $0x20] sm:$0xff]  ;;  %s1180_s26 = scalar_lea.hbm %s1179_s25, 208  ;;  %p1185_p0 = scmp.lt.s32.totalorder %s1179_s25, %s1828_s5 }
  0x1a   : > { %342 = vmatpush.msra.mxu0 %v274_v6  ;;  %398 = vmatpush.msra.mxu1 %v275_v7  ;;  %v254_v19 = vmul.f32 0.125, %v241_v18  ;;  %v256_v23 = vmul.f32 0.125, %v243_v22  ;;  %v257_v25 = vmul.f32 0.125, %v244_v24  ;;  %v245_v26 = vld [vmem:[%s1347_s14 + $0x28] sm:$0xff]  ;;  %v246_v28 = vld [vmem:[%s1347_s14 + $0x30] sm:$0xff]  ;;  %v247_v30 = vld [vmem:[%s1347_s14 + $0x38] sm:$0xff]  ;;  %p1181_p11 = scmp.ne.s32.totalorder %s1179_s25, %s1180_s26  ;;  %p1186_p1 = scmp.lt.s32.totalorder %s1184_s8, %s1180_s26 }
  0x1b   : > { %v258_v27 = vmul.f32 0.125, %v245_v26  ;;  %v259_v29 = vmul.f32 0.125, %v246_v28  ;;  %v260_v31 = vmul.f32 0.125, %v247_v30  ;;  %v248_v32 = vld [vmem:[%s1347_s14 + $0x40] sm:$0xff]  ;;  %v249_v34 = vld [vmem:[%s1347_s14 + $0x48] sm:$0xff]  ;;  %v250_v36 = vld [vmem:[%s1347_s14 + $0x50] sm:$0xff] }
  0x1c   : > { %343 = vmatpush.msra.mxu0 %v272_v8  ;;  %399 = vmatpush.msra.mxu1 %v273_v9  ;;  %v261_v33 = vmul.f32 0.125, %v248_v32  ;;  %v262_v35 = vmul.f32 0.125, %v249_v34  ;;  %v263_v37 = vmul.f32 0.125, %v250_v36  ;;  %v282_v38 = vld [vmem:[%s1826_s3] sm:$0x3]  ;;  %v251_v42 = vld [vmem:[%s1347_s14 + $0x58] sm:$0xff]  ;;  %p1182_p12 = pnand %p1181_p11, %p1298_p5  ;;  %p1187_p2 = por %p1186_p1, %p1185_p0 }
  0x1d   : > { %v283_v39 = vunpack.c.l.bf16 %v282_v38  ;;  %v264_v43 = vmul.f32 0.125, %v251_v42  ;;  %v252_v52 = vld [vmem:[%s1347_s14 + $0x60] sm:$0xff] }
  0x1e   : > { %344 = vmatpush.msra.mxu0 %v270_v10  ;;  %400 = vmatpush.msra.mxu1 %v271_v11  ;;  %v265_v53 = vmul.f32 0.125, %v252_v52  ;;  %p1183_p13 = pneg %p1182_p12 }
  0x1f   : > { %v285_v44 = vperm.slane %v283_v39, 0  ;;  %v286_v45 = vperm.slane %v283_v39, 2 }
  0x20   : > { %345 = vmatpush.msra.mxu0 %v268_v13  ;;  %401 = vmatpush.msra.mxu1 %v269_v14  ;;  %p1188_p3 = pnand %p1187_p2, %p1183_p13 }
  0x21   : > { %v1410_v46 = vperm.slane %v285_v44, 0  ;;  %v1412_v47 = vperm.slane %v286_v45, 0 }
  0x22   : > { %346 = vmatpush.msra.mxu0 %v266_v15  ;;  %402 = vmatpush.msra.mxu1 %v267_v16 }
  0x23   : > { %979 = vmatmul.msk.f32.vlgmr.msra.gmra.mxu0 %vm291_vm0, %v253_v17  ;;  %992 = vmatmul.msk.f32.vlgmr.msra.gmra.mxu1 %vm291_vm0, %v253_v17 }
  0x2b   : > { %980 = vmatmul.msk.f32.gmra.mxu0 %vm291_vm0, %v254_v19  ;;  %993 = vmatmul.msk.f32.gmra.mxu1 %vm291_vm0, %v254_v19 }
  0x33   : > { %981 = vmatmul.msk.f32.gmra.mxu0 %vm291_vm0, %v255_v21  ;;  %994 = vmatmul.msk.f32.gmra.mxu1 %vm291_vm0, %v255_v21 }
  0x3b   : > { %982 = vmatmul.msk.f32.gmra.mxu0 %vm291_vm0, %v256_v23  ;;  %995 = vmatmul.msk.f32.gmra.mxu1 %vm291_vm0, %v256_v23 }
  0x43   : > { %983 = vmatmul.msk.f32.gmra.mxu0 %vm291_vm0, %v257_v25  ;;  %996 = vmatmul.msk.f32.gmra.mxu1 %vm291_vm0, %v257_v25 }
  0x4b   : > { %984 = vmatmul.msk.f32.gmra.mxu0 %vm291_vm0, %v258_v27  ;;  %997 = vmatmul.msk.f32.gmra.mxu1 %vm291_vm0, %v258_v27 }
  0x53   : > { %985 = vmatmul.msk.f32.gmra.mxu0 %vm291_vm0, %v259_v29  ;;  %998 = vmatmul.msk.f32.gmra.mxu1 %vm291_vm0, %v259_v29 }
  0x5b   : > { %986 = vmatmul.msk.f32.gmra.mxu0 %vm291_vm0, %v260_v31  ;;  %999 = vmatmul.msk.f32.gmra.mxu1 %vm291_vm0, %v260_v31 }
  0x63   : > { %987 = vmatmul.msk.f32.gmra.mxu0 %vm291_vm0, %v261_v33  ;;  %1000 = vmatmul.msk.f32.gmra.mxu1 %vm291_vm0, %v261_v33 }
  0x6b   : > { %988 = vmatmul.msk.f32.gmra.mxu0 %vm291_vm0, %v262_v35  ;;  %1001 = vmatmul.msk.f32.gmra.mxu1 %vm291_vm0, %v262_v35 }
  0x73   : > { %989 = vmatmul.msk.f32.gmra.mxu0 %vm291_vm0, %v263_v37  ;;  %1002 = vmatmul.msk.f32.gmra.mxu1 %vm291_vm0, %v263_v37 }
  0x7b   : > { %990 = vmatmul.msk.f32.gmra.mxu0 %vm291_vm0, %v264_v43  ;;  %1003 = vmatmul.msk.f32.gmra.mxu1 %vm291_vm0, %v264_v43 }
  0x83   : > { %991 = vmatmul.msk.f32.gmra.mxu0 %vm291_vm0, %v265_v53  ;;  %1004 = vmatmul.msk.f32.gmra.mxu1 %vm291_vm0, %v265_v53 }
  0xa0   : > { %v1403_v40 = vpop.f32.mrf.mxu0  ;;  %v1405_v41 = vpop.f32.mrf.mxu1 }
  0xa8   : > { %v351_v48 = vpop.f32.mrf.mxu0  ;;  %v407_v49 = vpop.f32.mrf.mxu1 }
  0xa9   : > { %v352_v50 = vadd.f32 %v351_v48, %v1410_v46  ;;  %v408_v51 = vadd.f32 %v407_v49, %v1412_v47 }
  0xab   : > { %v446_v54 = vmax.f32 %v352_v50, %v408_v51 }
  0xad   : > { %447 = vmax.xlane.f32.xlu0 %v446_v54 }
  0xb0   : > { %v354_v55 = vpop.f32.mrf.mxu0  ;;  %v410_v56 = vpop.f32.mrf.mxu1 }
  0xb1   : > { %v355_v57 = vadd.f32 %v354_v55, %v1410_v46  ;;  %v411_v58 = vadd.f32 %v410_v56, %v1412_v47 }
  0xb3   : > { %v449_v59 = vmax.f32 %v355_v57, %v411_v58 }
  0xb5   : > { %450 = vmax.xlane.f32.xlu0 %v449_v59 }
  0xb8   : > { %v357_v60 = vpop.f32.mrf.mxu0  ;;  %v413_v61 = vpop.f32.mrf.mxu1 }
  0xb9   : > { %v358_v62 = vadd.f32 %v357_v60, %v1410_v46  ;;  %v414_v63 = vadd.f32 %v413_v61, %v1412_v47 }
  0xbb   : > { %v452_v0 = vmax.f32 %v358_v62, %v414_v63 }
  0xbd   : > { %453 = vmax.xlane.f32.xlu1 %v452_v0 }
  0xc0   : > { %v360_v1 = vpop.f32.mrf.mxu0  ;;  %v416_v2 = vpop.f32.mrf.mxu1 }
  0xc1   : > { %v1424_v3 = vadd.f32 %v360_v1, %v1410_v46  ;;  %v1427_v4 = vadd.f32 %v416_v2, %v1412_v47 }
  0xc3   : > { %v455_v5 = vmax.f32 %v1424_v3, %v1427_v4 }
  0xc5   : > { %456 = vmax.xlane.f32.xlu1 %v455_v5 }
  0xc8   : > { %v363_v6 = vpop.f32.mrf.mxu0  ;;  %v419_v7 = vpop.f32.mrf.mxu1 }
  0xc9   : > { %v1432_v8 = vadd.f32 %v363_v6, %v1410_v46  ;;  %v1435_v9 = vadd.f32 %v419_v7, %v1412_v47 }
  0xcb   : > { %v458_v10 = vmax.f32 %v1432_v8, %v1435_v9 }
  0xcd   : > { %459 = vmax.xlane.f32.xlu2 %v458_v10 }
  0xd0   : > { %v366_v11 = vpop.f32.mrf.mxu0  ;;  %v422_v12 = vpop.f32.mrf.mxu1 }
  0xd1   : > { %v1440_v13 = vadd.f32 %v366_v11, %v1410_v46  ;;  %v1443_v14 = vadd.f32 %v422_v12, %v1412_v47 }
  0xd3   : > { %v461_v15 = vmax.f32 %v1440_v13, %v1443_v14 }
  0xd5   : > { %462 = vmax.xlane.f32.xlu2 %v461_v15 }
  0xd8   : > { %v369_v16 = vpop.f32.mrf.mxu0  ;;  %v425_v17 = vpop.f32.mrf.mxu1 }
  0xd9   : > { %v1448_v18 = vadd.f32 %v369_v16, %v1410_v46  ;;  %v1451_v19 = vadd.f32 %v425_v17, %v1412_v47 }
  0xdb   : > { %v464_v20 = vmax.f32 %v1448_v18, %v1451_v19 }
  0xdd   : > { %465 = vmax.xlane.f32.xlu0 %v464_v20 }
  0xe0   : > { %v372_v21 = vpop.f32.mrf.mxu0  ;;  %v428_v22 = vpop.f32.mrf.mxu1 }
  0xe1   : > { %v1456_v23 = vadd.f32 %v372_v21, %v1410_v46  ;;  %v1459_v24 = vadd.f32 %v428_v22, %v1412_v47 }
  0xe3   : > { %v467_v25 = vmax.f32 %v1456_v23, %v1459_v24 }
  0xe5   : > { %468 = vmax.xlane.f32.xlu2 %v467_v25 }
  0xe8   : > { %v375_v31 = vpop.f32.mrf.mxu0  ;;  %v431_v32 = vpop.f32.mrf.mxu1 }
  0xe9   : > { %v1470_v43 = vadd.f32 %v375_v31, %v1410_v46  ;;  %v1473_v44 = vadd.f32 %v431_v32, %v1412_v47  ;;  %v733_v32 = vld [vmem:[%s1825_s2 + $0xf0] sm:$0xff] }
  0xeb   : > { %v470_v55 = vmax.f32 %v1470_v43, %v1473_v44 }
  0xf0   : > { %v378_v45 = vpop.f32.mrf.mxu0  ;;  %v434_v49 = vpop.f32.mrf.mxu1 }
  0xf1   : > { %v1487_v59 = vadd.f32 %v434_v49, %v1412_v47 }
  0xf8   : > { %v437_v0 = vpop.f32.mrf.mxu1 }
 0x120   : > { %v448_v26 = vpop.xlane.xlu0 %447 }
 0x121   : > { %v484_v27 = vsub.f32 %v352_v50, %v448_v26  ;;  %v485_v28 = vsub.f32 %v408_v51, %v448_v26  ;;  %v440_v26 = vpop.f32.mrf.mxu1 }
 0x123   : > { %v512_v29 = vmul.f32 1.442695, %v484_v27  ;;  %v514_v30 = vmul.f32 1.442695, %v485_v28  ;;  %v718_v28 = vld [vmem:[%s1825_s2 + $0x78] sm:$0xff] }
 0x124   : > { %1012 = vmatpush.msra.mxu2 %v718_v28  ;;  %735 = vmatpush.msrb.mxu0 %v718_v28  ;;  %v726_v28 = vld [vmem:[%s1825_s2 + $0xb8] sm:$0xff] }
 0x125   : > { %1086 = vpow2.f32 %v512_v29  ;;  %v734_v29 = vld [vmem:[%s1825_s2 + $0xf8] sm:$0xff] }
 0x126   : > { %1088 = vpow2.f32 %v514_v30  ;;  %v717_v30 = vld [vmem:[%s1825_s2 + $0x70] sm:$0xff]  ;;  %1028 = vmatpush.msra.mxu3 %v734_v29  ;;  %791 = vmatpush.msrb.mxu1 %v734_v29 }
 0x127   : > { %1013 = vmatpush.msra.mxu2 %v717_v30  ;;  %736 = vmatpush.msrb.mxu0 %v717_v30  ;;  %v709_v29 = vld [vmem:[%s1825_s2 + $0x30] sm:$0xff] }
 0x128   : > { %v451_v33 = vpop.xlane.xlu0 %450  ;;  %1029 = vmatpush.msra.mxu3 %v733_v32  ;;  %792 = vmatpush.msrb.mxu1 %v733_v32  ;;  %v725_v30 = vld [vmem:[%s1825_s2 + $0xb0] sm:$0xff]  ;;  %v724_v32 = vld [vmem:[%s1825_s2 + $0xa8] sm:$0xff] }
 0x129   : > { %v486_v34 = vsub.f32 %v355_v57, %v451_v33  ;;  %v487_v35 = vsub.f32 %v411_v58, %v451_v33  ;;  %v1484_v58 = vadd.f32 %v378_v45, %v1410_v46 }
 0x12b   : > { %v1463_v36 = vpop.eup %1086  ;;  %v516_v37 = vmul.f32 1.442695, %v486_v34  ;;  %v518_v38 = vmul.f32 1.442695, %v487_v35  ;;  %v473_v6 = vmax.f32 %v1484_v58, %v1487_v59  ;;  %v716_v35 = vld [vmem:[%s1825_s2 + $0x68] sm:$0xff] }
 0x12c   : > { %v1465_v39 = vpop.eup %1088  ;;  %1014 = vmatpush.msra.mxu2 %v716_v35  ;;  %737 = vmatpush.msrb.mxu0 %v716_v35  ;;  %v706_v35 = vld [vmem:[%s1825_s2 + $0x18] sm:$0xff] }
 0x12d   : > { %1090 = vpow2.f32 %v516_v37  ;;  %v563_v42 = vadd.f32 %v1465_v39, %v1463_v36  ;;  %v732_v37 = vld [vmem:[%s1825_s2 + $0xe8] sm:$0xff] }
 0x12e   : > { %1092 = vpow2.f32 %v518_v38  ;;  %1030 = vmatpush.msra.mxu3 %v732_v37  ;;  %793 = vmatpush.msrb.mxu1 %v732_v37  ;;  %v722_v37 = vld [vmem:[%s1825_s2 + $0x98] sm:$0xff] }
 0x12f   : > { %564 = vadd.xlane.f32.xlu1 %v563_v42 }
 0x130   : > { %v454_v48 = vpop.xlane.xlu1 %453 }
 0x131   : > { %v488_v50 = vsub.f32 %v358_v62, %v454_v48  ;;  %v489_v51 = vsub.f32 %v414_v63, %v454_v48  ;;  %v381_v63 = vpop.f32.mrf.mxu0  ;;  %v731_v48 = vld [vmem:[%s1825_s2 + $0xe0] sm:$0xff] }
 0x132   : > { %1031 = vmatpush.msra.mxu3 %v731_v48  ;;  %794 = vmatpush.msrb.mxu1 %v731_v48  ;;  %v703_v48 = vld [vmem:[%s1825_s2] sm:$0xff] }
 0x133   : > { %v1475_v52 = vpop.eup %1090  ;;  %v520_v53 = vmul.f32 1.442695, %v488_v50  ;;  %v522_v54 = vmul.f32 1.442695, %v489_v51  ;;  %v714_v51 = vld [vmem:[%s1825_s2 + $0x58] sm:$0xff] }
 0x134   : > { %v1479_v56 = vpop.eup %1092 }
 0x135   : > { %1094 = vpow2.f32 %v520_v53  ;;  %v566_v57 = vadd.f32 %v1479_v56, %v1475_v52  ;;  %v730_v53 = vld [vmem:[%s1825_s2 + $0xd8] sm:$0xff] }
 0x136   : > { %1096 = vpow2.f32 %v522_v54  ;;  %v713_v54 = vld [vmem:[%s1825_s2 + $0x50] sm:$0xff]  ;;  %1032 = vmatpush.msra.mxu3 %v730_v53  ;;  %795 = vmatpush.msrb.mxu1 %v730_v53 }
 0x137   : > { %471 = vmax.xlane.f32.xlu1 %v470_v55  ;;  %567 = vadd.xlane.f32.xlu0 %v566_v57  ;;  %v729_v55 = vld [vmem:[%s1825_s2 + $0xd0] sm:$0xff]  ;;  %v1569_v57 = vadd.f32 %v1403_v40, %v1410_v46  ;;  %v728_v40 = vld [vmem:[%s1825_s2 + $0xc8] sm:$0xff] }
 0x138   : > { %v457_v60 = vpop.xlane.xlu1 %456  ;;  %1033 = vmatpush.msra.mxu3 %v729_v55  ;;  %796 = vmatpush.msrb.mxu1 %v729_v55 }
 0x139   : > { %v490_v61 = vsub.f32 %v1424_v3, %v457_v60  ;;  %v491_v62 = vsub.f32 %v1427_v4, %v457_v60  ;;  %v1500_v3 = vadd.f32 %v381_v63, %v1410_v46  ;;  %v1503_v4 = vadd.f32 %v437_v0, %v1412_v47  ;;  %v384_v25 = vpop.f32.mrf.mxu0  ;;  %v712_v0 = vld [vmem:[%s1825_s2 + $0x48] sm:$0xff] }
 0x13a   : > { %1034 = vmatpush.msra.mxu3 %v728_v40  ;;  %797 = vmatpush.msrb.mxu1 %v728_v40 }
 0x13b   : > { %v1491_v1 = vpop.eup %1094  ;;  %v524_v2 = vmul.f32 1.442695, %v490_v61  ;;  %v526_v5 = vmul.f32 1.442695, %v491_v62  ;;  %v476_v21 = vmax.f32 %v1500_v3, %v1503_v4  ;;  %v1573_v61 = vadd.f32 %v1405_v41, %v1412_v47 }
 0x13c   : > { %v1495_v7 = vpop.eup %1096 }
 0x13d   : > { %1098 = vpow2.f32 %v524_v2  ;;  %v569_v10 = vadd.f32 %v1495_v7, %v1491_v1 }
 0x13e   : > { %1100 = vpow2.f32 %v526_v5 }
 0x13f   : > { %570 = vadd.xlane.f32.xlu2 %v569_v10  ;;  %474 = vmax.xlane.f32.xlu0 %v473_v6  ;;  %v443_v6 = vmax.f32 %v1569_v57, %v1573_v61 }
 0x140   : > { %v460_v11 = vpop.xlane.xlu2 %459 }
 0x141   : > { %v492_v12 = vsub.f32 %v1432_v8, %v460_v11  ;;  %v493_v15 = vsub.f32 %v1435_v9, %v460_v11  ;;  %v1516_v8 = vadd.f32 %v384_v25, %v1410_v46  ;;  %v1519_v9 = vadd.f32 %v440_v26, %v1412_v47 }
 0x143   : > { %v1507_v16 = vpop.eup %1098  ;;  %v528_v17 = vmul.f32 1.442695, %v492_v12  ;;  %v530_v20 = vmul.f32 1.442695, %v493_v15 }
 0x144   : > { %v1511_v22 = vpop.eup %1100 }
 0x145   : > { %1102 = vpow2.f32 %v528_v17  ;;  %v572_v27 = vadd.f32 %v1511_v22, %v1507_v16 }
 0x146   : > { %1104 = vpow2.f32 %v530_v20 }
 0x147   : > { %477 = vmax.xlane.f32.xlu2 %v476_v21  ;;  %573 = vadd.xlane.f32.xlu1 %v572_v27 }
 0x148   : > { %v463_v31 = vpop.xlane.xlu2 %462 }
 0x149   : > { %v494_v33 = vsub.f32 %v1440_v13, %v463_v31  ;;  %v495_v34 = vsub.f32 %v1443_v14, %v463_v31  ;;  %v479_v13 = vmax.f32 %v1516_v8, %v1519_v9  ;;  %v715_v14 = vld [vmem:[%s1825_s2 + $0x60] sm:$0xff]  ;;  %v708_v31 = vld [vmem:[%s1825_s2 + $0x28] sm:$0xff] }
 0x14a   : > { %1015 = vmatpush.msra.mxu2 %v715_v14  ;;  %738 = vmatpush.msrb.mxu0 %v715_v14  ;;  %v720_v14 = vld [vmem:[%s1825_s2 + $0x88] sm:$0xff] }
 0x14b   : > { %v1541_v38 = vpop.eup %1102  ;;  %v532_v42 = vmul.f32 1.442695, %v494_v33  ;;  %v534_v45 = vmul.f32 1.442695, %v495_v34  ;;  %v707_v33 = vld [vmem:[%s1825_s2 + $0x20] sm:$0xff] }
 0x14c   : > { %v1551_v49 = vpop.eup %1104  ;;  %1016 = vmatpush.msra.mxu2 %v714_v51  ;;  %739 = vmatpush.msrb.mxu0 %v714_v51  ;;  %v723_v34 = vld [vmem:[%s1825_s2 + $0xa0] sm:$0xff] }
 0x14d   : > { %1106 = vpow2.f32 %v532_v42  ;;  %v575_v50 = vadd.f32 %v1551_v49, %v1541_v38  ;;  %v705_v42 = vld [vmem:[%s1825_s2 + $0x10] sm:$0xff] }
 0x14e   : > { %1108 = vpow2.f32 %v534_v45  ;;  %1017 = vmatpush.msra.mxu2 %v713_v54  ;;  %740 = vmatpush.msrb.mxu0 %v713_v54  ;;  %v721_v45 = vld [vmem:[%s1825_s2 + $0x90] sm:$0xff] }
 0x14f   : > { %480 = vmax.xlane.f32.xlu1 %v479_v13  ;;  %576 = vadd.xlane.f32.xlu0 %v575_v50  ;;  %v704_v13 = vld [vmem:[%s1825_s2 + $0x8] sm:$0xff]  ;;  %v719_v50 = vld [vmem:[%s1825_s2 + $0x80] sm:$0xff] }
 0x150   : > { %v466_v60 = vpop.xlane.xlu0 %465  ;;  %1018 = vmatpush.msra.mxu2 %v712_v0  ;;  %741 = vmatpush.msrb.mxu0 %v712_v0 }
 0x151   : > { %v496_v62 = vsub.f32 %v1448_v18, %v466_v60  ;;  %v497_v63 = vsub.f32 %v1451_v19, %v466_v60  ;;  %v711_v18 = vld [vmem:[%s1825_s2 + $0x40] sm:$0xff] }
 0x152   : > { %v727_v19 = vld [vmem:[%s1825_s2 + $0xc0] sm:$0xff]  ;;  %1019 = vmatpush.msra.mxu2 %v711_v18  ;;  %742 = vmatpush.msrb.mxu0 %v711_v18 }
 0x153   : > { %v1583_v46 = vpop.eup %1106  ;;  %v536_v41 = vmul.f32 1.442695, %v496_v62  ;;  %v538_v47 = vmul.f32 1.442695, %v497_v63  ;;  %1035 = vmatpush.msra.mxu3 %v727_v19  ;;  %798 = vmatpush.msrb.mxu1 %v727_v19 }
 0x154   : > { %v1591_v2 = vpop.eup %1108 }
 0x155   : > { %1110 = vpow2.f32 %v536_v41  ;;  %v578_v5 = vadd.f32 %v1591_v2, %v1583_v46  ;;  %1036 = vmatpush.msra.mxu3 %v726_v28  ;;  %799 = vmatpush.msrb.mxu1 %v726_v28 }
 0x156   : > { %1112 = vpow2.f32 %v538_v47 }
 0x157   : > { %579 = vadd.xlane.f32.xlu2 %v578_v5  ;;  %444 = vmax.xlane.f32.xlu0 %v443_v6 }
 0x158   : > { %v469_v10 = vpop.xlane.xlu2 %468  ;;  %1037 = vmatpush.msra.mxu3 %v725_v30  ;;  %800 = vmatpush.msrb.mxu1 %v725_v30 }
 0x159   : > { %v498_v11 = vsub.f32 %v1456_v23, %v469_v10  ;;  %v499_v12 = vsub.f32 %v1459_v24, %v469_v10  ;;  %v710_v24 = vld [vmem:[%s1825_s2 + $0x38] sm:$0xff] }
 0x15a   : > { %1020 = vmatpush.msra.mxu2 %v710_v24  ;;  %743 = vmatpush.msrb.mxu0 %v710_v24 }
 0x15b   : > { %v1599_v15 = vpop.eup %1110  ;;  %v540_v17 = vmul.f32 1.442695, %v498_v11  ;;  %v542_v20 = vmul.f32 1.442695, %v499_v12  ;;  %1038 = vmatpush.msra.mxu3 %v724_v32  ;;  %801 = vmatpush.msrb.mxu1 %v724_v32 }
 0x15c   : > { %v1601_v21 = vpop.eup %1112  ;;  %1021 = vmatpush.msra.mxu2 %v709_v29  ;;  %744 = vmatpush.msrb.mxu0 %v709_v29 }
 0x15d   : > { %1114 = vpow2.f32 %v540_v17  ;;  %v581_v25 = vadd.f32 %v1601_v21, %v1599_v15  ;;  %1039 = vmatpush.msra.mxu3 %v723_v34  ;;  %802 = vmatpush.msrb.mxu1 %v723_v34 }
 0x15e   : > { %1116 = vpow2.f32 %v542_v20  ;;  %1022 = vmatpush.msra.mxu2 %v708_v31  ;;  %745 = vmatpush.msrb.mxu0 %v708_v31 }
 0x15f   : > { %582 = vadd.xlane.f32.xlu1 %v581_v25  ;;  %1040 = vmatpush.msra.mxu3 %v722_v37 }
 0x160   : > { %1023 = vmatpush.msra.mxu2 %v707_v33  ;;  %746 = vmatpush.msrb.mxu0 %v707_v33 }
 0x161   : > { %803 = vmatpush.msrb.mxu1 %v722_v37  ;;  %1041 = vmatpush.msra.mxu3 %v721_v45 }
 0x162   : > { %1024 = vmatpush.msra.mxu2 %v706_v35  ;;  %747 = vmatpush.msrb.mxu0 %v706_v35 }
 0x163   : > { %v1605_v26 = vpop.eup %1114  ;;  %804 = vmatpush.msrb.mxu1 %v721_v45  ;;  %1042 = vmatpush.msra.mxu3 %v720_v14 }
 0x164   : > { %v1607_v27 = vpop.eup %1116  ;;  %1025 = vmatpush.msra.mxu2 %v705_v42  ;;  %748 = vmatpush.msrb.mxu0 %v705_v42 }
 0x165   : > { %v584_v23 = vadd.f32 %v1607_v27, %v1605_v26  ;;  %805 = vmatpush.msrb.mxu1 %v720_v14  ;;  %1043 = vmatpush.msra.mxu3 %v719_v50 }
 0x166   : > { %1026 = vmatpush.msra.mxu2 %v704_v13  ;;  %749 = vmatpush.msrb.mxu0 %v704_v13 }
 0x167   : > { %585 = vadd.xlane.f32.xlu2 %v584_v23  ;;  %806 = vmatpush.msrb.mxu1 %v719_v50 }
 0x168   : > { %1027 = vmatpush.msra.mxu2 %v703_v48  ;;  %750 = vmatpush.msrb.mxu0 %v703_v48 }
 0x1a2   : > { %v565_v51 = vpop.xlane.xlu1 %564 }
 0x1a3   : > { %1118 = vrcp.f32 %v565_v51 }
 0x1a9   : > { %v1119_v53 = vpop.eup %1118 }
 0x1aa   : > { %v613_v54 = vmul.f32 %v1119_v53, %v565_v51  ;;  %v472_v55 = vpop.xlane.xlu1 %471  ;;  %v568_v60 = vpop.xlane.xlu0 %567 }
 0x1ab   : > { %v500_v62 = vsub.f32 %v1470_v43, %v472_v55  ;;  %v501_v63 = vsub.f32 %v1473_v44, %v472_v55  ;;  %1120 = vrcp.f32 %v568_v60 }
 0x1ac   : > { %v626_v0 = vsub.f32 2.0, %v613_v54 }
 0x1ad   : > { %v544_v40 = vmul.f32 1.442695, %v500_v62  ;;  %v546_v41 = vmul.f32 1.442695, %v501_v63 }
 0x1ae   : > { %v639_v47 = vmul.f32 %v1119_v53, %v626_v0 }
 0x1af   : > { %1122 = vpow2.f32 %v544_v40 }
 0x1b0   : > { %1124 = vpow2.f32 %v546_v41  ;;  %v653_v18 = vmul.f32 %v1463_v36, %v639_v47  ;;  %v654_v19 = vmul.f32 %v1465_v39, %v639_v47 }
 0x1b1   : > { %v1121_v5 = vpop.eup %1120 }
 0x1b2   : > { %v614_v6 = vmul.f32 %v1121_v5, %v568_v60  ;;  %v571_v10 = vpop.xlane.xlu2 %570  ;;  %679 = vst [vmem:[%s1666_s9 + $0x10] sm:$0xff] %v653_v18  ;;  %754 = vmatmul.f32.vlgmr.msra.gmra.mxu2 %v653_v18  ;;  %810 = vmatmul.f32.vlgmr.msra.gmra.mxu3 %v654_v19  ;;  %v475_v43 = vpop.xlane.xlu0 %474 }
 0x1b3   : > { %1126 = vrcp.f32 %v571_v10  ;;  %680 = vst [vmem:[%s1666_s9 + $0x18] sm:$0xff] %v654_v19  ;;  %v502_v44 = vsub.f32 %v1484_v58, %v475_v43  ;;  %v503_v11 = vsub.f32 %v1487_v59, %v475_v43 }
 0x1b4   : > { %v627_v36 = vsub.f32 2.0, %v614_v6 }
 0x1b5   : > { %v1672_v39 = vpop.eup %1122  ;;  %v548_v12 = vmul.f32 1.442695, %v502_v44  ;;  %v550_v17 = vmul.f32 1.442695, %v503_v11 }
 0x1b6   : > { %v1674_v20 = vpop.eup %1124  ;;  %v640_v25 = vmul.f32 %v1121_v5, %v627_v36 }
 0x1b7   : > { %1128 = vpow2.f32 %v548_v12  ;;  %v587_v23 = vadd.f32 %v1674_v20, %v1672_v39 }
 0x1b8   : > { %1130 = vpow2.f32 %v550_v17  ;;  %v655_v24 = vmul.f32 %v1475_v52, %v640_v25  ;;  %v656_v58 = vmul.f32 %v1479_v56, %v640_v25 }
 0x1b9   : > { %v1127_v59 = vpop.eup %1126  ;;  %588 = vadd.xlane.f32.xlu0 %v587_v23 }
 0x1ba   : > { %v615_v28 = vmul.f32 %v1127_v59, %v571_v10  ;;  %v478_v29 = vpop.xlane.xlu2 %477  ;;  %v574_v30 = vpop.xlane.xlu1 %573  ;;  %681 = vst [vmem:[%s1666_s9 + $0x20] sm:$0xff] %v655_v24  ;;  %757 = vmatmul.f32.gmra.mxu2 %v655_v24  ;;  %813 = vmatmul.f32.gmra.mxu3 %v656_v58 }
 0x1bb   : > { %v504_v31 = vsub.f32 %v1500_v3, %v478_v29  ;;  %v505_v32 = vsub.f32 %v1503_v4, %v478_v29  ;;  %1132 = vrcp.f32 %v574_v30  ;;  %682 = vst [vmem:[%s1666_s9 + $0x28] sm:$0xff] %v656_v58 }
 0x1bc   : > { %v628_v33 = vsub.f32 2.0, %v615_v28 }
 0x1bd   : > { %v1684_v34 = vpop.eup %1128  ;;  %v552_v52 = vmul.f32 1.442695, %v504_v31  ;;  %v554_v56 = vmul.f32 1.442695, %v505_v32 }
 0x1be   : > { %v1686_v35 = vpop.eup %1130  ;;  %v641_v37 = vmul.f32 %v1127_v59, %v628_v33 }
 0x1bf   : > { %1134 = vpow2.f32 %v552_v52  ;;  %v590_v42 = vadd.f32 %v1686_v35, %v1684_v34 }
 0x1c0   : > { %1136 = vpow2.f32 %v554_v56  ;;  %v657_v3 = vmul.f32 %v1491_v1, %v641_v37  ;;  %v658_v4 = vmul.f32 %v1495_v7, %v641_v37 }
 0x1c1   : > { %v1133_v45 = vpop.eup %1132  ;;  %591 = vadd.xlane.f32.xlu1 %v590_v42 }
 0x1c2   : > { %v616_v13 = vmul.f32 %v1133_v45, %v574_v30  ;;  %v481_v14 = vpop.xlane.xlu1 %480  ;;  %683 = vst [vmem:[%s1666_s9 + $0x30] sm:$0xff] %v657_v3  ;;  %760 = vmatmul.f32.gmra.mxu2 %v657_v3  ;;  %816 = vmatmul.f32.gmra.mxu3 %v658_v4  ;;  %v577_v48 = vpop.xlane.xlu0 %576 }
 0x1c3   : > { %v506_v50 = vsub.f32 %v1516_v8, %v481_v14  ;;  %v507_v51 = vsub.f32 %v1519_v9, %v481_v14  ;;  %684 = vst [vmem:[%s1666_s9 + $0x38] sm:$0xff] %v658_v4  ;;  %1138 = vrcp.f32 %v577_v48 }
 0x1c4   : > { %v629_v53 = vsub.f32 2.0, %v616_v13 }
 0x1c5   : > { %v1696_v54 = vpop.eup %1134  ;;  %v556_v1 = vmul.f32 1.442695, %v506_v50  ;;  %v558_v7 = vmul.f32 1.442695, %v507_v51 }
 0x1c6   : > { %v1698_v55 = vpop.eup %1136  ;;  %v642_v60 = vmul.f32 %v1133_v45, %v629_v53 }
 0x1c7   : > { %1140 = vpow2.f32 %v556_v1  ;;  %v593_v62 = vadd.f32 %v1698_v55, %v1696_v54 }
 0x1c8   : > { %1142 = vpow2.f32 %v558_v7  ;;  %v659_v8 = vmul.f32 %v1507_v16, %v642_v60  ;;  %v660_v9 = vmul.f32 %v1511_v22, %v642_v60 }
 0x1c9   : > { %v1139_v63 = vpop.eup %1138  ;;  %594 = vadd.xlane.f32.xlu2 %v593_v62 }
 0x1ca   : > { %v617_v0 = vmul.f32 %v1139_v63, %v577_v48  ;;  %v580_v40 = vpop.xlane.xlu2 %579  ;;  %685 = vst [vmem:[%s1666_s9 + $0x40] sm:$0xff] %v659_v8  ;;  %763 = vmatmul.f32.gmra.mxu2 %v659_v8  ;;  %819 = vmatmul.f32.gmra.mxu3 %v660_v9  ;;  %v445_v41 = vpop.xlane.xlu0 %444 }
 0x1cb   : > { %1144 = vrcp.f32 %v580_v40  ;;  %686 = vst [vmem:[%s1666_s9 + $0x48] sm:$0xff] %v660_v9  ;;  %v482_v47 = vsub.f32 %v1569_v57, %v445_v41  ;;  %v483_v18 = vsub.f32 %v1573_v61, %v445_v41 }
 0x1cc   : > { %v630_v19 = vsub.f32 2.0, %v617_v0 }
 0x1cd   : > { %v1708_v5 = vpop.eup %1140  ;;  %v508_v16 = vmul.f32 1.442695, %v482_v47  ;;  %v510_v22 = vmul.f32 1.442695, %v483_v18 }
 0x1ce   : > { %v1710_v6 = vpop.eup %1142  ;;  %v643_v10 = vmul.f32 %v1139_v63, %v630_v19 }
 0x1cf   : > { %1146 = vpow2.f32 %v508_v16  ;;  %v596_v43 = vadd.f32 %v1710_v6, %v1708_v5 }
 0x1d0   : > { %1148 = vpow2.f32 %v510_v22  ;;  %v661_v44 = vmul.f32 %v1541_v38, %v643_v10  ;;  %v662_v57 = vmul.f32 %v1551_v49, %v643_v10 }
 0x1d1   : > { %v1145_v61 = vpop.eup %1144  ;;  %597 = vadd.xlane.f32.xlu0 %v596_v43 }
 0x1d2   : > { %v618_v11 = vmul.f32 %v1145_v61, %v580_v40  ;;  %v583_v36 = vpop.xlane.xlu1 %582  ;;  %687 = vst [vmem:[%s1666_s9 + $0x50] sm:$0xff] %v661_v44  ;;  %766 = vmatmul.f32.gmra.mxu2 %v661_v44  ;;  %822 = vmatmul.f32.gmra.mxu3 %v662_v57 }
 0x1d3   : > { %1150 = vrcp.f32 %v583_v36  ;;  %688 = vst [vmem:[%s1666_s9 + $0x58] sm:$0xff] %v662_v57 }
 0x1d4   : > { %v631_v12 = vsub.f32 2.0, %v618_v11 }
 0x1d5   : > { %v1718_v17 = vpop.eup %1146 }
 0x1d6   : > { %v1720_v25 = vpop.eup %1148  ;;  %v644_v23 = vmul.f32 %v1145_v61, %v631_v12 }
 0x1d7   : > { %v560_v38 = vadd.f32 %v1720_v25, %v1718_v17 }
 0x1d8   : > { %v663_v49 = vmul.f32 %v1583_v46, %v644_v23  ;;  %v664_v24 = vmul.f32 %v1591_v2, %v644_v23 }
 0x1d9   : > { %v1151_v58 = vpop.eup %1150  ;;  %561 = vadd.xlane.f32.xlu1 %v560_v38 }
 0x1da   : > { %v619_v59 = vmul.f32 %v1151_v58, %v583_v36  ;;  %v586_v28 = vpop.xlane.xlu2 %585  ;;  %689 = vst [vmem:[%s1666_s9 + $0x60] sm:$0xff] %v663_v49  ;;  %769 = vmatmul.f32.gmra.mxu2 %v663_v49  ;;  %825 = vmatmul.f32.gmra.mxu3 %v664_v24 }
 0x1db   : > { %1152 = vrcp.f32 %v586_v28  ;;  %690 = vst [vmem:[%s1666_s9 + $0x68] sm:$0xff] %v664_v24 }
 0x1dc   : > { %v632_v29 = vsub.f32 2.0, %v619_v59 }
 0x1de   : > { %v645_v30 = vmul.f32 %v1151_v58, %v632_v29 }
 0x1e0   : > { %v665_v31 = vmul.f32 %v1599_v15, %v645_v30  ;;  %v666_v46 = vmul.f32 %v1601_v21, %v645_v30 }
 0x1e1   : > { %v1153_v2 = vpop.eup %1152 }
 0x1e2   : > { %v620_v32 = vmul.f32 %v1153_v2, %v586_v28  ;;  %691 = vst [vmem:[%s1666_s9 + $0x70] sm:$0xff] %v665_v31  ;;  %772 = vmatmul.f32.gmra.mxu2 %v665_v31  ;;  %828 = vmatmul.f32.gmra.mxu3 %v666_v46 }
 0x1e3   : > { %692 = vst [vmem:[%s1666_s9 + $0x78] sm:$0xff] %v666_v46 }
 0x1e4   : > { %v633_v33 = vsub.f32 2.0, %v620_v32 }
 0x1e6   : > { %v646_v52 = vmul.f32 %v1153_v2, %v633_v33 }
 0x1e8   : > { %v667_v56 = vmul.f32 %v1605_v26, %v646_v52  ;;  %v668_v37 = vmul.f32 %v1607_v27, %v646_v52 }
 0x1ea   : > { %693 = vst [vmem:[%s1666_s9 + $0x80] sm:$0xff] %v667_v56  ;;  %775 = vmatmul.f32.gmra.mxu2 %v667_v56  ;;  %831 = vmatmul.f32.gmra.mxu3 %v668_v37 }
 0x1eb   : > { %694 = vst [vmem:[%s1666_s9 + $0x88] sm:$0xff] %v668_v37 }
 0x22c   : > { %v589_v15 = vpop.xlane.xlu0 %588 }
 0x22d   : > { %1154 = vrcp.f32 %v589_v15 }
 0x233   : > { %v1155_v21 = vpop.eup %1154 }
 0x234   : > { %v621_v42 = vmul.f32 %v1155_v21, %v589_v15  ;;  %v592_v3 = vpop.xlane.xlu1 %591 }
 0x235   : > { %1156 = vrcp.f32 %v592_v3  ;;  %v755_v4 = vpop.f32.mrf.mxu2  ;;  %v811_v26 = vpop.f32.mrf.mxu3 }
 0x236   : > { %v634_v27 = vsub.f32 2.0, %v621_v42  ;;  %v812_v45 = vadd.f32 %v811_v26, %v755_v4 }
 0x238   : > { %848 = vst.msk [vmem:[%s1741_s15 + $0x8] sm:$0xff] %vm291_vm0, %v812_v45  ;;  %v647_v13 = vmul.f32 %v1155_v21, %v634_v27 }
 0x23a   : > { %v669_v14 = vmul.f32 %v1672_v39, %v647_v13  ;;  %v670_v48 = vmul.f32 %v1674_v20, %v647_v13 }
 0x23b   : > { %v1157_v50 = vpop.eup %1156 }
 0x23c   : > { %v622_v51 = vmul.f32 %v1157_v50, %v592_v3  ;;  %v595_v53 = vpop.xlane.xlu2 %594  ;;  %695 = vst [vmem:[%s1666_s9 + $0x90] sm:$0xff] %v669_v14  ;;  %778 = vmatmul.f32.gmra.mxu2 %v669_v14  ;;  %834 = vmatmul.f32.gmra.mxu3 %v670_v48 }
 0x23d   : > { %1158 = vrcp.f32 %v595_v53  ;;  %696 = vst [vmem:[%s1666_s9 + $0x98] sm:$0xff] %v670_v48  ;;  %v758_v1 = vpop.f32.mrf.mxu2  ;;  %v814_v7 = vpop.f32.mrf.mxu3 }
 0x23e   : > { %v635_v60 = vsub.f32 2.0, %v622_v51  ;;  %v815_v62 = vadd.f32 %v814_v7, %v758_v1 }
 0x240   : > { %849 = vst.msk [vmem:[%s1741_s15 + $0x10] sm:$0xff] %vm291_vm0, %v815_v62  ;;  %v648_v8 = vmul.f32 %v1157_v50, %v635_v60 }
 0x242   : > { %v671_v39 = vmul.f32 %v1684_v34, %v648_v8  ;;  %v672_v20 = vmul.f32 %v1686_v35, %v648_v8 }
 0x243   : > { %v1159_v9 = vpop.eup %1158 }
 0x244   : > { %v623_v63 = vmul.f32 %v1159_v9, %v595_v53  ;;  %697 = vst [vmem:[%s1666_s9 + $0xa0] sm:$0xff] %v671_v39  ;;  %781 = vmatmul.f32.gmra.mxu2 %v671_v39  ;;  %837 = vmatmul.f32.gmra.mxu3 %v672_v20  ;;  %v598_v0 = vpop.xlane.xlu0 %597 }
 0x245   : > { %698 = vst [vmem:[%s1666_s9 + $0xa8] sm:$0xff] %v672_v20  ;;  %1160 = vrcp.f32 %v598_v0  ;;  %v761_v40 = vpop.f32.mrf.mxu2  ;;  %v817_v41 = vpop.f32.mrf.mxu3 }
 0x246   : > { %v636_v47 = vsub.f32 2.0, %v623_v63  ;;  %v818_v18 = vadd.f32 %v817_v41, %v761_v40 }
 0x248   : > { %v649_v19 = vmul.f32 %v1159_v9, %v636_v47  ;;  %850 = vst.msk [vmem:[%s1741_s15 + $0x18] sm:$0xff] %vm291_vm0, %v818_v18 }
 0x24a   : > { %v673_v34 = vmul.f32 %v1696_v54, %v649_v19  ;;  %v674_v35 = vmul.f32 %v1698_v55, %v649_v19 }
 0x24b   : > { %v1161_v16 = vpop.eup %1160 }
 0x24c   : > { %v624_v22 = vmul.f32 %v1161_v16, %v598_v0  ;;  %v562_v10 = vpop.xlane.xlu1 %561  ;;  %699 = vst [vmem:[%s1666_s9 + $0xb0] sm:$0xff] %v673_v34  ;;  %784 = vmatmul.f32.gmra.mxu2 %v673_v34  ;;  %840 = vmatmul.f32.gmra.mxu3 %v674_v35 }
 0x24d   : > { %1162 = vrcp.f32 %v562_v10  ;;  %700 = vst [vmem:[%s1666_s9 + $0xb8] sm:$0xff] %v674_v35  ;;  %v764_v43 = vpop.f32.mrf.mxu2  ;;  %v820_v44 = vpop.f32.mrf.mxu3 }
 0x24e   : > { %v637_v57 = vsub.f32 2.0, %v624_v22  ;;  %v821_v61 = vadd.f32 %v820_v44, %v764_v43 }
 0x250   : > { %v650_v11 = vmul.f32 %v1161_v16, %v637_v57  ;;  %851 = vst.msk [vmem:[%s1741_s15 + $0x20] sm:$0xff] %vm291_vm0, %v821_v61 }
 0x252   : > { %v675_v54 = vmul.f32 %v1708_v5, %v650_v11  ;;  %v676_v55 = vmul.f32 %v1710_v6, %v650_v11 }
 0x253   : > { %v1163_v36 = vpop.eup %1162 }
 0x254   : > { %v612_v12 = vmul.f32 %v1163_v36, %v562_v10  ;;  %701 = vst [vmem:[%s1666_s9 + $0xc0] sm:$0xff] %v675_v54  ;;  %787 = vmatmul.f32.gmra.mxu2 %v675_v54  ;;  %843 = vmatmul.f32.gmra.mxu3 %v676_v55 }
 0x255   : > { %702 = vst [vmem:[%s1666_s9 + $0xc8] sm:$0xff] %v676_v55  ;;  %v767_v23 = vpop.f32.mrf.mxu2  ;;  %v823_v38 = vpop.f32.mrf.mxu3 }
 0x256   : > { %v625_v49 = vsub.f32 2.0, %v612_v12  ;;  %v824_v24 = vadd.f32 %v823_v38, %v767_v23 }
 0x258   : > { %v638_v58 = vmul.f32 %v1163_v36, %v625_v49  ;;  %852 = vst.msk [vmem:[%s1741_s15 + $0x28] sm:$0xff] %vm291_vm0, %v824_v24 }
 0x25a   : > { %v651_v5 = vmul.f32 %v1718_v17, %v638_v58  ;;  %v652_v6 = vmul.f32 %v1720_v25, %v638_v58 }
 0x25c   : > { %677 = vst [vmem:[%s1666_s9] sm:$0xff] %v651_v5  ;;  %751 = vmatmul.f32.vlgmr.msrb.gmra.mxu0 %v651_v5  ;;  %807 = vmatmul.f32.vlgmr.msrb.gmra.mxu1 %v652_v6 }
 0x25d   : > { %678 = vst [vmem:[%s1666_s9 + $0x8] sm:$0xff] %v652_v6  ;;  %v770_v59 = vpop.f32.mrf.mxu2  ;;  %v826_v28 = vpop.f32.mrf.mxu3 }
 0x25e   : > { %v827_v29 = vadd.f32 %v826_v28, %v770_v59 }
 0x25f   : > { %1191 = shalt.err (!%p1188_p3)
}
 0x260   : > { %s1228_s7 = smov 256   ;;  %s1229_s9 = smov 16   ;;  %853 = vst.msk [vmem:[%s1741_s15 + $0x30] sm:$0xff] %vm291_vm0, %v827_v29 }
 0x261   : > { %1045 = dma.vmem_to_hbm [thread:$0]  (%p1298_p5), %s884_s17, 3328, %s886_s23, %s866_s22, %s1228_s7, %s1228_s7, %s1229_s9  }
 0x265   : > { %v773_v17 = vpop.f32.mrf.mxu2  ;;  %v829_v25 = vpop.f32.mrf.mxu3 }
 0x266   : > { %v830_v30 = vadd.f32 %v829_v25, %v773_v17 }
 0x268   : > { %854 = vst.msk [vmem:[%s1741_s15 + $0x38] sm:$0xff] %vm291_vm0, %v830_v30 }
 0x26d   : > { %v776_v31 = vpop.f32.mrf.mxu2  ;;  %v832_v46 = vpop.f32.mrf.mxu3 }
 0x26e   : > { %v833_v2 = vadd.f32 %v832_v46, %v776_v31 }
 0x270   : > { %855 = vst.msk [vmem:[%s1741_s15 + $0x40] sm:$0xff] %vm291_vm0, %v833_v2 }
 0x2bf   : > { %v779_v32 = vpop.f32.mrf.mxu2  ;;  %v835_v33 = vpop.f32.mrf.mxu3 }
 0x2c0   : > { %v836_v52 = vadd.f32 %v835_v33, %v779_v32 }
 0x2c2   : > { %856 = vst.msk [vmem:[%s1741_s15 + $0x48] sm:$0xff] %vm291_vm0, %v836_v52 }
 0x2c7   : > { %v782_v56 = vpop.f32.mrf.mxu2  ;;  %v838_v37 = vpop.f32.mrf.mxu3 }
 0x2c8   : > { %v839_v15 = vadd.f32 %v838_v37, %v782_v56 }
 0x2ca   : > { %857 = vst.msk [vmem:[%s1741_s15 + $0x50] sm:$0xff] %vm291_vm0, %v839_v15 }
 0x2cf   : > { %v785_v21 = vpop.f32.mrf.mxu2  ;;  %v841_v42 = vpop.f32.mrf.mxu3 }
 0x2d0   : > { %v842_v3 = vadd.f32 %v841_v42, %v785_v21 }
 0x2d2   : > { %858 = vst.msk [vmem:[%s1741_s15 + $0x58] sm:$0xff] %vm291_vm0, %v842_v3 }
 0x2d7   : > { %v788_v4 = vpop.f32.mrf.mxu2  ;;  %v844_v26 = vpop.f32.mrf.mxu3 }
 0x2d8   : > { %v845_v27 = vadd.f32 %v844_v26, %v788_v4 }
 0x2d9   : > { %v752_v45 = vpop.f32.mrf.mxu0  ;;  %v808_v13 = vpop.f32.mrf.mxu1 }
 0x2da   : > { %859 = vst.msk [vmem:[%s1741_s15 + $0x60] sm:$0xff] %vm291_vm0, %v845_v27  ;;  %v809_v14 = vadd.f32 %v808_v13, %v752_v45 }
 0x2dc   : > { %847 = vst.msk [vmem:[%s1741_s15] sm:$0xff] %vm291_vm0, %v809_v14 }
 0x2dd PF: > { %p1051_p4 = scmp.ge.s32.totalorder %s1226_s21, 2  ;;  %s908_s28 = sand.u32 1, %s1214_s18  }
 0x2de   : > { %s909_s11 = scalar_lea.sflag [#allocation3], %s908_s28 }
 0x2df   : > { %p1048_p5 = pnand %p1051_p4, %p1302_p6 }
 0x2e1   : > { %p1049_p7 = pneg %p1048_p5 }
 0x2e3   : > { %1209 = dma.done.wait (%p1049_p7), %s909_s11, 3328  }
 0x2e4   : > { %1211 = vsyncadd (%p1049_p7), %s909_s11, 4294963968  ;;  %p16_p8 = scmp.ge.s32.totalorder %s1285_s24, 5   ;;  %s1831_s18 = smov %s1218_s19 }
 0x2e5   : > { %s1832_s19 = smov %s1222_s20  ;;  %s1833_s20 = smov %s1296_s27 }
 0x2e6   : > { %s1834_s21 = smov %s1285_s24  ;;  %18 = sbr.rel (!%p16_p8) target bundleno = 3 (0x3), region = 83 }
 0x2eb   :  { %915 = vsyncpa [#allocation3], 1 }
 0x2ec   :  { %917 = vsyncpa [#allocation3 + $0x1], 1 }

// kernel: tpu_custom_call.1
= control target key start
LH: loop header
LB: loop body
LE: loop exit
PB: predicated region body
PF: predicated region fallthrough
CT: control target
= control target key end

     0   :  { %11 = vsyncpa [#allocation3], 0  ;;  %s1823_s0 = inlined_call_operand.vmem [shape: f32[312,64], index: 0, kind: input, shape index: {}]   ;;  %s1824_s1 = inlined_call_operand.vmem [shape: f32[64,256], index: 1, kind: input, shape index: {}]   ;;  %s1825_s2 = inlined_call_operand.vmem [shape: f32[256,64], index: 2, kind: input, shape index: {}]   ;;  %s1826_s3 = inlined_call_operand.vmem [shape: bf16[1,256], index: 3, kind: input, shape index: {}]   ;;  %s1827_s4 = inlined_call_operand.vmem [shape: f32[312,64], index: 4, kind: output, shape index: {0}]   ;;  %s1828_s5 = inlined_call_operand.hbm [shape: f32[312,256], index: 5, kind: output, shape index: {1}]  }
   0x1   :  { %13 = vsyncpa [#allocation3 + $0x1], 0  ;;  %s1260_s18 = smov 0   ;;  %s1262_s19 = smov 0  }
   0x2   :  { %s1264_s20 = smov 0   ;;  %s1266_s21 = smov 0  }
   0x3 LB: > { %s1281_s22 = sadd.s32 4294967295, %s1226_s21   ;;  %s973_s23 = sadd.s32 4294967294, %s1226_s21   ;;  %s1226_s21 = sphi %s1266_s21, %s1834_s21   ;;  %s1222_s20 = sphi %s1264_s20, %s1833_s20   ;;  %s1218_s19 = sphi %s1262_s19, %s1832_s19   ;;  %s1214_s18 = sphi %s1260_s18, %s1831_s18  }
   0x4   : > { %s1285_s24 = sadd.s32 1, %s1226_s21   ;;  %s141_s25 = sadd.s32 1, %s1222_s20 }
   0x5   : > { %s138_s26 = ssub.s32 %s1226_s21, %s1285_s24  ;;  %p151_p0 = scmp.ne.s32.totalorder %s1222_s20, %s1218_s19 }
   0x6   : > { %p139_p1 = scmp.eq.s32.totalorder %s138_s26, 0  ;;  %p152_p2 = scmp.eq.s32.totalorder %s1281_s22, 2 }
   0x7   : > { %p157_p3 = scmp.ne.s32.totalorder %s1218_s19, %s1214_s18  ;;  %p158_p4 = scmp.eq.s32.totalorder %s973_s23, 2 }
   0x8   : > { %s1296_s27 = scalar_select %p139_p1, %s1222_s20, %s141_s25  }
   0x9   : > { %p1298_p5 = por %p152_p2, %p151_p0  ;;  %p1302_p6 = por %p158_p4, %p157_p3 }
   0xa   : > { %p976_p7 = scmp.ge.s32.totalorder %s1226_s21, 1  ;;  %p194_p8 = scmp.lt.s32.totalorder %s1226_s21, 4 }
   0xc   : > { %p195_p9 = pnand %p976_p7, %p194_p8 }
   0xd   : > { %s227_s11 = smul.u32 (!%p195_p9), 13, %s1281_s22  ;;  %s224_s7 = sand.u32 (!%p195_p9), 1, %s1218_s19  }
   0xe   : > { %198 = sbr.rel (%p195_p9) target bundleno = 733 (0x2dd), region = 36 }
   0xf   : > { %p228_p10 = scmp.lt.s32.totalorder (!%p195_p9), %s227_s11, 38  ;;  %s1044_s8 = smul.u32 (!%p195_p9), 208, %s224_s7 }
  0x11   : > { %s1666_s9 = scalar_lea.vmem (!%p195_p9), [#allocation2], %s1044_s8  ;;  %s1184_s8 = scalar_lea.hbm (!%p195_p9), %s1828_s5, 624 }
  0x12   : > { %s883_s17 = sshll.u32 (!%p195_p9), %s1666_s9, 4  ;;  %s884_s17 = int_to_ptr.vmem [resolvable:$true] %s883_s17 }
  0x13   : > { %v280_v0 = vld [vmem:[%s1824_s1 + $0x70] sm:$0xff]  ;;  %v281_v1 = vld [vmem:[%s1824_s1 + $0x78] sm:$0xff]  ;;  %v278_v2 = vld [vmem:[%s1824_s1 + $0x60] sm:$0xff]  ;;  %s1836_s11 = smov (!%p228_p10, %s227_s11), 38  ;;  %vm291_vm0 = vcmask 523264  }
  0x14   : > { %339 = vmatpush.msra.mxu0 %v280_v0  ;;  %395 = vmatpush.msra.mxu1 %v281_v1  ;;  %v279_v3 = vld [vmem:[%s1824_s1 + $0x68] sm:$0xff]  ;;  %v276_v4 = vld [vmem:[%s1824_s1 + $0x50] sm:$0xff]  ;;  %v277_v5 = vld [vmem:[%s1824_s1 + $0x58] sm:$0xff]  ;;  %s977_s10 = sshll.u32 %s1836_s11, 3  ;;  %s1011_s11 = smul.u32 208, %s1281_s22 }
  0x15   : > { %v274_v6 = vld [vmem:[%s1824_s1 + $0x40] sm:$0xff]  ;;  %v275_v7 = vld [vmem:[%s1824_s1 + $0x48] sm:$0xff]  ;;  %v272_v8 = vld [vmem:[%s1824_s1 + $0x30] sm:$0xff]  ;;  %s1347_s14 = scalar_lea.vmem %s1823_s0, %s977_s10  ;;  %s1741_s15 = scalar_lea.vmem %s1827_s4, %s977_s10 }
  0x16   : > { %340 = vmatpush.msra.mxu0 %v278_v2  ;;  %396 = vmatpush.msra.mxu1 %v279_v3  ;;  %v273_v9 = vld [vmem:[%s1824_s1 + $0x38] sm:$0xff]  ;;  %v270_v10 = vld [vmem:[%s1824_s1 + $0x20] sm:$0xff]  ;;  %v271_v11 = vld [vmem:[%s1824_s1 + $0x28] sm:$0xff]  ;;  %s882_s16 = scalar_lea.hbm %s1828_s5, %s1011_s11  ;;  %s866_s22 = scalar_lea.sflag [#allocation3], %s224_s7 }
  0x17   : > { %v240_v12 = vld [vmem:[%s1347_s14] sm:$0xff]  ;;  %v268_v13 = vld [vmem:[%s1824_s1 + $0x10] sm:$0xff]  ;;  %v269_v14 = vld [vmem:[%s1824_s1 + $0x18] sm:$0xff]  ;;  %s885_s23 = sshll.u32 %s882_s16, 4  ;;  %s886_s23 = int_to_ptr.hbm [resolvable:$true] %s885_s23 }
  0x18   : > { %341 = vmatpush.msra.mxu0 %v276_v4  ;;  %397 = vmatpush.msra.mxu1 %v277_v5  ;;  %v266_v15 = vld [vmem:[%s1824_s1] sm:$0xff]  ;;  %v267_v16 = vld [vmem:[%s1824_s1 + $0x8] sm:$0xff]  ;;  %v253_v17 = vmul.f32 0.125, %v240_v12  ;;  %v242_v20 = vld [vmem:[%s1347_s14 + $0x10] sm:$0xff]  ;;  %s1178_s25 = sshra.s32 %s886_s23, 4  ;;  %s1179_s25 = int_to_ptr.hbm [resolvable:$true] %s1178_s25 }
  0x19   : > { %v241_v18 = vld [vmem:[%s1347_s14 + $0x8] sm:$0xff]  ;;  %v255_v21 = vmul.f32 0.125, %v242_v20  ;;  %v243_v22 = vld [vmem:[%s1347_s14 + $0x18] sm:$0xff]  ;;  %v244_v24 = vld [vmem:[%s1347_s14 + $0x20] sm:$0xff]  ;;  %s1180_s26 = scalar_lea.hbm %s1179_s25, 208  ;;  %p1185_p0 = scmp.lt.s32.totalorder %s1179_s25, %s1828_s5 }
  0x1a   : > { %342 = vmatpush.msra.mxu0 %v274_v6  ;;  %398 = vmatpush.msra.mxu1 %v275_v7  ;;  %v254_v19 = vmul.f32 0.125, %v241_v18  ;;  %v256_v23 = vmul.f32 0.125, %v243_v22  ;;  %v257_v25 = vmul.f32 0.125, %v244_v24  ;;  %v245_v26 = vld [vmem:[%s1347_s14 + $0x28] sm:$0xff]  ;;  %v246_v28 = vld [vmem:[%s1347_s14 + $0x30] sm:$0xff]  ;;  %v247_v30 = vld [vmem:[%s1347_s14 + $0x38] sm:$0xff]  ;;  %p1181_p11 = scmp.ne.s32.totalorder %s1179_s25, %s1180_s26  ;;  %p1186_p1 = scmp.lt.s32.totalorder %s1184_s8, %s1180_s26 }
  0x1b   : > { %v258_v27 = vmul.f32 0.125, %v245_v26  ;;  %v259_v29 = vmul.f32 0.125, %v246_v28  ;;  %v260_v31 = vmul.f32 0.125, %v247_v30  ;;  %v248_v32 = vld [vmem:[%s1347_s14 + $0x40] sm:$0xff]  ;;  %v249_v34 = vld [vmem:[%s1347_s14 + $0x48] sm:$0xff]  ;;  %v250_v36 = vld [vmem:[%s1347_s14 + $0x50] sm:$0xff] }
  0x1c   : > { %343 = vmatpush.msra.mxu0 %v272_v8  ;;  %399 = vmatpush.msra.mxu1 %v273_v9  ;;  %v261_v33 = vmul.f32 0.125, %v248_v32  ;;  %v262_v35 = vmul.f32 0.125, %v249_v34  ;;  %v263_v37 = vmul.f32 0.125, %v250_v36  ;;  %v282_v38 = vld [vmem:[%s1826_s3] sm:$0x3]  ;;  %v251_v42 = vld [vmem:[%s1347_s14 + $0x58] sm:$0xff]  ;;  %p1182_p12 = pnand %p1181_p11, %p1298_p5  ;;  %p1187_p2 = por %p1186_p1, %p1185_p0 }
  0x1d   : > { %v283_v39 = vunpack.c.l.bf16 %v282_v38  ;;  %v264_v43 = vmul.f32 0.125, %v251_v42  ;;  %v252_v52 = vld [vmem:[%s1347_s14 + $0x60] sm:$0xff] }
  0x1e   : > { %344 = vmatpush.msra.mxu0 %v270_v10  ;;  %400 = vmatpush.msra.mxu1 %v271_v11  ;;  %v265_v53 = vmul.f32 0.125, %v252_v52  ;;  %p1183_p13 = pneg %p1182_p12 }
  0x1f   : > { %v285_v44 = vperm.slane %v283_v39, 0  ;;  %v286_v45 = vperm.slane %v283_v39, 2 }
  0x20   : > { %345 = vmatpush.msra.mxu0 %v268_v13  ;;  %401 = vmatpush.msra.mxu1 %v269_v14  ;;  %p1188_p3 = pnand %p1187_p2, %p1183_p13 }
  0x21   : > { %v1410_v46 = vperm.slane %v285_v44, 0  ;;  %v1412_v47 = vperm.slane %v286_v45, 0 }
  0x22   : > { %346 = vmatpush.msra.mxu0 %v266_v15  ;;  %402 = vmatpush.msra.mxu1 %v267_v16 }
  0x23   : > { %979 = vmatmul.msk.f32.vlgmr.msra.gmra.mxu0 %vm291_vm0, %v253_v17  ;;  %992 = vmatmul.msk.f32.vlgmr.msra.gmra.mxu1 %vm291_vm0, %v253_v17 }
  0x2b   : > { %980 = vmatmul.msk.f32.gmra.mxu0 %vm291_vm0, %v254_v19  ;;  %993 = vmatmul.msk.f32.gmra.mxu1 %vm291_vm0, %v254_v19 }
  0x33   : > { %981 = vmatmul.msk.f32.gmra.mxu0 %vm291_vm0, %v255_v21  ;;  %994 = vmatmul.msk.f32.gmra.mxu1 %vm291_vm0, %v255_v21 }
  0x3b   : > { %982 = vmatmul.msk.f32.gmra.mxu0 %vm291_vm0, %v256_v23  ;;  %995 = vmatmul.msk.f32.gmra.mxu1 %vm291_vm0, %v256_v23 }
  0x43   : > { %983 = vmatmul.msk.f32.gmra.mxu0 %vm291_vm0, %v257_v25  ;;  %996 = vmatmul.msk.f32.gmra.mxu1 %vm291_vm0, %v257_v25 }
  0x4b   : > { %984 = vmatmul.msk.f32.gmra.mxu0 %vm291_vm0, %v258_v27  ;;  %997 = vmatmul.msk.f32.gmra.mxu1 %vm291_vm0, %v258_v27 }
  0x53   : > { %985 = vmatmul.msk.f32.gmra.mxu0 %vm291_vm0, %v259_v29  ;;  %998 = vmatmul.msk.f32.gmra.mxu1 %vm291_vm0, %v259_v29 }
  0x5b   : > { %986 = vmatmul.msk.f32.gmra.mxu0 %vm291_vm0, %v260_v31  ;;  %999 = vmatmul.msk.f32.gmra.mxu1 %vm291_vm0, %v260_v31 }
  0x63   : > { %987 = vmatmul.msk.f32.gmra.mxu0 %vm291_vm0, %v261_v33  ;;  %1000 = vmatmul.msk.f32.gmra.mxu1 %vm291_vm0, %v261_v33 }
  0x6b   : > { %988 = vmatmul.msk.f32.gmra.mxu0 %vm291_vm0, %v262_v35  ;;  %1001 = vmatmul.msk.f32.gmra.mxu1 %vm291_vm0, %v262_v35 }
  0x73   : > { %989 = vmatmul.msk.f32.gmra.mxu0 %vm291_vm0, %v263_v37  ;;  %1002 = vmatmul.msk.f32.gmra.mxu1 %vm291_vm0, %v263_v37 }
  0x7b   : > { %990 = vmatmul.msk.f32.gmra.mxu0 %vm291_vm0, %v264_v43  ;;  %1003 = vmatmul.msk.f32.gmra.mxu1 %vm291_vm0, %v264_v43 }
  0x83   : > { %991 = vmatmul.msk.f32.gmra.mxu0 %vm291_vm0, %v265_v53  ;;  %1004 = vmatmul.msk.f32.gmra.mxu1 %vm291_vm0, %v265_v53 }
  0xa0   : > { %v1403_v40 = vpop.f32.mrf.mxu0  ;;  %v1405_v41 = vpop.f32.mrf.mxu1 }
  0xa8   : > { %v351_v48 = vpop.f32.mrf.mxu0  ;;  %v407_v49 = vpop.f32.mrf.mxu1 }
  0xa9   : > { %v352_v50 = vadd.f32 %v351_v48, %v1410_v46  ;;  %v408_v51 = vadd.f32 %v407_v49, %v1412_v47 }
  0xab   : > { %v446_v54 = vmax.f32 %v352_v50, %v408_v51 }
  0xad   : > { %447 = vmax.xlane.f32.xlu0 %v446_v54 }
  0xb0   : > { %v354_v55 = vpop.f32.mrf.mxu0  ;;  %v410_v56 = vpop.f32.mrf.mxu1 }
  0xb1   : > { %v355_v57 = vadd.f32 %v354_v55, %v1410_v46  ;;  %v411_v58 = vadd.f32 %v410_v56, %v1412_v47 }
  0xb3   : > { %v449_v59 = vmax.f32 %v355_v57, %v411_v58 }
  0xb5   : > { %450 = vmax.xlane.f32.xlu0 %v449_v59 }
  0xb8   : > { %v357_v60 = vpop.f32.mrf.mxu0  ;;  %v413_v61 = vpop.f32.mrf.mxu1 }
  0xb9   : > { %v358_v62 = vadd.f32 %v357_v60, %v1410_v46  ;;  %v414_v63 = vadd.f32 %v413_v61, %v1412_v47 }
  0xbb   : > { %v452_v0 = vmax.f32 %v358_v62, %v414_v63 }
  0xbd   : > { %453 = vmax.xlane.f32.xlu1 %v452_v0 }
  0xc0   : > { %v360_v1 = vpop.f32.mrf.mxu0  ;;  %v416_v2 = vpop.f32.mrf.mxu1 }
  0xc1   : > { %v1424_v3 = vadd.f32 %v360_v1, %v1410_v46  ;;  %v1427_v4 = vadd.f32 %v416_v2, %v1412_v47 }
  0xc3   : > { %v455_v5 = vmax.f32 %v1424_v3, %v1427_v4 }
  0xc5   : > { %456 = vmax.xlane.f32.xlu1 %v455_v5 }
  0xc8   : > { %v363_v6 = vpop.f32.mrf.mxu0  ;;  %v419_v7 = vpop.f32.mrf.mxu1 }
  0xc9   : > { %v1432_v8 = vadd.f32 %v363_v6, %v1410_v46  ;;  %v1435_v9 = vadd.f32 %v419_v7, %v1412_v47 }
  0xcb   : > { %v458_v10 = vmax.f32 %v1432_v8, %v1435_v9 }
  0xcd   : > { %459 = vmax.xlane.f32.xlu2 %v458_v10 }
  0xd0   : > { %v366_v11 = vpop.f32.mrf.mxu0  ;;  %v422_v12 = vpop.f32.mrf.mxu1 }
  0xd1   : > { %v1440_v13 = vadd.f32 %v366_v11, %v1410_v46  ;;  %v1443_v14 = vadd.f32 %v422_v12, %v1412_v47 }
  0xd3   : > { %v461_v15 = vmax.f32 %v1440_v13, %v1443_v14 }
  0xd5   : > { %462 = vmax.xlane.f32.xlu2 %v461_v15 }
  0xd8   : > { %v369_v16 = vpop.f32.mrf.mxu0  ;;  %v425_v17 = vpop.f32.mrf.mxu1 }
  0xd9   : > { %v1448_v18 = vadd.f32 %v369_v16, %v1410_v46  ;;  %v1451_v19 = vadd.f32 %v425_v17, %v1412_v47 }
  0xdb   : > { %v464_v20 = vmax.f32 %v1448_v18, %v1451_v19 }
  0xdd   : > { %465 = vmax.xlane.f32.xlu0 %v464_v20 }
  0xe0   : > { %v372_v21 = vpop.f32.mrf.mxu0  ;;  %v428_v22 = vpop.f32.mrf.mxu1 }
  0xe1   : > { %v1456_v23 = vadd.f32 %v372_v21, %v1410_v46  ;;  %v1459_v24 = vadd.f32 %v428_v22, %v1412_v47 }
  0xe3   : > { %v467_v25 = vmax.f32 %v1456_v23, %v1459_v24 }
  0xe5   : > { %468 = vmax.xlane.f32.xlu2 %v467_v25 }
  0xe8   : > { %v375_v31 = vpop.f32.mrf.mxu0  ;;  %v431_v32 = vpop.f32.mrf.mxu1 }
  0xe9   : > { %v1470_v43 = vadd.f32 %v375_v31, %v1410_v46  ;;  %v1473_v44 = vadd.f32 %v431_v32, %v1412_v47  ;;  %v733_v32 = vld [vmem:[%s1825_s2 + $0xf0] sm:$0xff] }
  0xeb   : > { %v470_v55 = vmax.f32 %v1470_v43, %v1473_v44 }
  0xf0   : > { %v378_v45 = vpop.f32.mrf.mxu0  ;;  %v434_v49 = vpop.f32.mrf.mxu1 }
  0xf1   : > { %v1487_v59 = vadd.f32 %v434_v49, %v1412_v47 }
  0xf8   : > { %v437_v0 = vpop.f32.mrf.mxu1 }
 0x120   : > { %v448_v26 = vpop.xlane.xlu0 %447 }
 0x121   : > { %v484_v27 = vsub.f32 %v352_v50, %v448_v26  ;;  %v485_v28 = vsub.f32 %v408_v51, %v448_v26  ;;  %v440_v26 = vpop.f32.mrf.mxu1 }
 0x123   : > { %v512_v29 = vmul.f32 1.442695, %v484_v27  ;;  %v514_v30 = vmul.f32 1.442695, %v485_v28  ;;  %v718_v28 = vld [vmem:[%s1825_s2 + $0x78] sm:$0xff] }
 0x124   : > { %1012 = vmatpush.msra.mxu2 %v718_v28  ;;  %735 = vmatpush.msrb.mxu0 %v718_v28  ;;  %v726_v28 = vld [vmem:[%s1825_s2 + $0xb8] sm:$0xff] }
 0x125   : > { %1086 = vpow2.f32 %v512_v29  ;;  %v734_v29 = vld [vmem:[%s1825_s2 + $0xf8] sm:$0xff] }
 0x126   : > { %1088 = vpow2.f32 %v514_v30  ;;  %v717_v30 = vld [vmem:[%s1825_s2 + $0x70] sm:$0xff]  ;;  %1028 = vmatpush.msra.mxu3 %v734_v29  ;;  %791 = vmatpush.msrb.mxu1 %v734_v29 }
 0x127   : > { %1013 = vmatpush.msra.mxu2 %v717_v30  ;;  %736 = vmatpush.msrb.mxu0 %v717_v30  ;;  %v709_v29 = vld [vmem:[%s1825_s2 + $0x30] sm:$0xff] }
 0x128   : > { %v451_v33 = vpop.xlane.xlu0 %450  ;;  %1029 = vmatpush.msra.mxu3 %v733_v32  ;;  %792 = vmatpush.msrb.mxu1 %v733_v32  ;;  %v725_v30 = vld [vmem:[%s1825_s2 + $0xb0] sm:$0xff]  ;;  %v724_v32 = vld [vmem:[%s1825_s2 + $0xa8] sm:$0xff] }
 0x129   : > { %v486_v34 = vsub.f32 %v355_v57, %v451_v33  ;;  %v487_v35 = vsub.f32 %v411_v58, %v451_v33  ;;  %v1484_v58 = vadd.f32 %v378_v45, %v1410_v46 }
 0x12b   : > { %v1463_v36 = vpop.eup %1086  ;;  %v516_v37 = vmul.f32 1.442695, %v486_v34  ;;  %v518_v38 = vmul.f32 1.442695, %v487_v35  ;;  %v473_v6 = vmax.f32 %v1484_v58, %v1487_v59  ;;  %v716_v35 = vld [vmem:[%s1825_s2 + $0x68] sm:$0xff] }
 0x12c   : > { %v1465_v39 = vpop.eup %1088  ;;  %1014 = vmatpush.msra.mxu2 %v716_v35  ;;  %737 = vmatpush.msrb.mxu0 %v716_v35  ;;  %v706_v35 = vld [vmem:[%s1825_s2 + $0x18] sm:$0xff] }
 0x12d   : > { %1090 = vpow2.f32 %v516_v37  ;;  %v563_v42 = vadd.f32 %v1465_v39, %v1463_v36  ;;  %v732_v37 = vld [vmem:[%s1825_s2 + $0xe8] sm:$0xff] }
 0x12e   : > { %1092 = vpow2.f32 %v518_v38  ;;  %1030 = vmatpush.msra.mxu3 %v732_v37  ;;  %793 = vmatpush.msrb.mxu1 %v732_v37  ;;  %v722_v37 = vld [vmem:[%s1825_s2 + $0x98] sm:$0xff] }
 0x12f   : > { %564 = vadd.xlane.f32.xlu1 %v563_v42 }
 0x130   : > { %v454_v48 = vpop.xlane.xlu1 %453 }
 0x131   : > { %v488_v50 = vsub.f32 %v358_v62, %v454_v48  ;;  %v489_v51 = vsub.f32 %v414_v63, %v454_v48  ;;  %v381_v63 = vpop.f32.mrf.mxu0  ;;  %v731_v48 = vld [vmem:[%s1825_s2 + $0xe0] sm:$0xff] }
 0x132   : > { %1031 = vmatpush.msra.mxu3 %v731_v48  ;;  %794 = vmatpush.msrb.mxu1 %v731_v48  ;;  %v703_v48 = vld [vmem:[%s1825_s2] sm:$0xff] }
 0x133   : > { %v1475_v52 = vpop.eup %1090  ;;  %v520_v53 = vmul.f32 1.442695, %v488_v50  ;;  %v522_v54 = vmul.f32 1.442695, %v489_v51  ;;  %v714_v51 = vld [vmem:[%s1825_s2 + $0x58] sm:$0xff] }
 0x134   : > { %v1479_v56 = vpop.eup %1092 }
 0x135   : > { %1094 = vpow2.f32 %v520_v53  ;;  %v566_v57 = vadd.f32 %v1479_v56, %v1475_v52  ;;  %v730_v53 = vld [vmem:[%s1825_s2 + $0xd8] sm:$0xff] }
 0x136   : > { %1096 = vpow2.f32 %v522_v54  ;;  %v713_v54 = vld [vmem:[%s1825_s2 + $0x50] sm:$0xff]  ;;  %1032 = vmatpush.msra.mxu3 %v730_v53  ;;  %795 = vmatpush.msrb.mxu1 %v730_v53 }
 0x137   : > { %471 = vmax.xlane.f32.xlu1 %v470_v55  ;;  %567 = vadd.xlane.f32.xlu0 %v566_v57  ;;  %v729_v55 = vld [vmem:[%s1825_s2 + $0xd0] sm:$0xff]  ;;  %v1569_v57 = vadd.f32 %v1403_v40, %v1410_v46  ;;  %v728_v40 = vld [vmem:[%s1825_s2 + $0xc8] sm:$0xff] }
 0x138   : > { %v457_v60 = vpop.xlane.xlu1 %456  ;;  %1033 = vmatpush.msra.mxu3 %v729_v55  ;;  %796 = vmatpush.msrb.mxu1 %v729_v55 }
 0x139   : > { %v490_v61 = vsub.f32 %v1424_v3, %v457_v60  ;;  %v491_v62 = vsub.f32 %v1427_v4, %v457_v60  ;;  %v1500_v3 = vadd.f32 %v381_v63, %v1410_v46  ;;  %v1503_v4 = vadd.f32 %v437_v0, %v1412_v47  ;;  %v384_v25 = vpop.f32.mrf.mxu0  ;;  %v712_v0 = vld [vmem:[%s1825_s2 + $0x48] sm:$0xff] }
 0x13a   : > { %1034 = vmatpush.msra.mxu3 %v728_v40  ;;  %797 = vmatpush.msrb.mxu1 %v728_v40 }
 0x13b   : > { %v1491_v1 = vpop.eup %1094  ;;  %v524_v2 = vmul.f32 1.442695, %v490_v61  ;;  %v526_v5 = vmul.f32 1.442695, %v491_v62  ;;  %v476_v21 = vmax.f32 %v1500_v3, %v1503_v4  ;;  %v1573_v61 = vadd.f32 %v1405_v41, %v1412_v47 }
 0x13c   : > { %v1495_v7 = vpop.eup %1096 }
 0x13d   : > { %1098 = vpow2.f32 %v524_v2  ;;  %v569_v10 = vadd.f32 %v1495_v7, %v1491_v1 }
 0x13e   : > { %1100 = vpow2.f32 %v526_v5 }
 0x13f   : > { %570 = vadd.xlane.f32.xlu2 %v569_v10  ;;  %474 = vmax.xlane.f32.xlu0 %v473_v6  ;;  %v443_v6 = vmax.f32 %v1569_v57, %v1573_v61 }
 0x140   : > { %v460_v11 = vpop.xlane.xlu2 %459 }
 0x141   : > { %v492_v12 = vsub.f32 %v1432_v8, %v460_v11  ;;  %v493_v15 = vsub.f32 %v1435_v9, %v460_v11  ;;  %v1516_v8 = vadd.f32 %v384_v25, %v1410_v46  ;;  %v1519_v9 = vadd.f32 %v440_v26, %v1412_v47 }
 0x143   : > { %v1507_v16 = vpop.eup %1098  ;;  %v528_v17 = vmul.f32 1.442695, %v492_v12  ;;  %v530_v20 = vmul.f32 1.442695, %v493_v15 }
 0x144   : > { %v1511_v22 = vpop.eup %1100 }
 0x145   : > { %1102 = vpow2.f32 %v528_v17  ;;  %v572_v27 = vadd.f32 %v1511_v22, %v1507_v16 }
 0x146   : > { %1104 = vpow2.f32 %v530_v20 }
 0x147   : > { %477 = vmax.xlane.f32.xlu2 %v476_v21  ;;  %573 = vadd.xlane.f32.xlu1 %v572_v27 }
 0x148   : > { %v463_v31 = vpop.xlane.xlu2 %462 }
 0x149   : > { %v494_v33 = vsub.f32 %v1440_v13, %v463_v31  ;;  %v495_v34 = vsub.f32 %v1443_v14, %v463_v31  ;;  %v479_v13 = vmax.f32 %v1516_v8, %v1519_v9  ;;  %v715_v14 = vld [vmem:[%s1825_s2 + $0x60] sm:$0xff]  ;;  %v708_v31 = vld [vmem:[%s1825_s2 + $0x28] sm:$0xff] }
 0x14a   : > { %1015 = vmatpush.msra.mxu2 %v715_v14  ;;  %738 = vmatpush.msrb.mxu0 %v715_v14  ;;  %v720_v14 = vld [vmem:[%s1825_s2 + $0x88] sm:$0xff] }
 0x14b   : > { %v1541_v38 = vpop.eup %1102  ;;  %v532_v42 = vmul.f32 1.442695, %v494_v33  ;;  %v534_v45 = vmul.f32 1.442695, %v495_v34  ;;  %v707_v33 = vld [vmem:[%s1825_s2 + $0x20] sm:$0xff] }
 0x14c   : > { %v1551_v49 = vpop.eup %1104  ;;  %1016 = vmatpush.msra.mxu2 %v714_v51  ;;  %739 = vmatpush.msrb.mxu0 %v714_v51  ;;  %v723_v34 = vld [vmem:[%s1825_s2 + $0xa0] sm:$0xff] }
 0x14d   : > { %1106 = vpow2.f32 %v532_v42  ;;  %v575_v50 = vadd.f32 %v1551_v49, %v1541_v38  ;;  %v705_v42 = vld [vmem:[%s1825_s2 + $0x10] sm:$0xff] }
 0x14e   : > { %1108 = vpow2.f32 %v534_v45  ;;  %1017 = vmatpush.msra.mxu2 %v713_v54  ;;  %740 = vmatpush.msrb.mxu0 %v713_v54  ;;  %v721_v45 = vld [vmem:[%s1825_s2 + $0x90] sm:$0xff] }
 0x14f   : > { %480 = vmax.xlane.f32.xlu1 %v479_v13  ;;  %576 = vadd.xlane.f32.xlu0 %v575_v50  ;;  %v704_v13 = vld [vmem:[%s1825_s2 + $0x8] sm:$0xff]  ;;  %v719_v50 = vld [vmem:[%s1825_s2 + $0x80] sm:$0xff] }
 0x150   : > { %v466_v60 = vpop.xlane.xlu0 %465  ;;  %1018 = vmatpush.msra.mxu2 %v712_v0  ;;  %741 = vmatpush.msrb.mxu0 %v712_v0 }
 0x151   : > { %v496_v62 = vsub.f32 %v1448_v18, %v466_v60  ;;  %v497_v63 = vsub.f32 %v1451_v19, %v466_v60  ;;  %v711_v18 = vld [vmem:[%s1825_s2 + $0x40] sm:$0xff] }
 0x152   : > { %v727_v19 = vld [vmem:[%s1825_s2 + $0xc0] sm:$0xff]  ;;  %1019 = vmatpush.msra.mxu2 %v711_v18  ;;  %742 = vmatpush.msrb.mxu0 %v711_v18 }
 0x153   : > { %v1583_v46 = vpop.eup %1106  ;;  %v536_v41 = vmul.f32 1.442695, %v496_v62  ;;  %v538_v47 = vmul.f32 1.442695, %v497_v63  ;;  %1035 = vmatpush.msra.mxu3 %v727_v19  ;;  %798 = vmatpush.msrb.mxu1 %v727_v19 }
 0x154   : > { %v1591_v2 = vpop.eup %1108 }
 0x155   : > { %1110 = vpow2.f32 %v536_v41  ;;  %v578_v5 = vadd.f32 %v1591_v2, %v1583_v46  ;;  %1036 = vmatpush.msra.mxu3 %v726_v28  ;;  %799 = vmatpush.msrb.mxu1 %v726_v28 }
 0x156   : > { %1112 = vpow2.f32 %v538_v47 }
 0x157   : > { %579 = vadd.xlane.f32.xlu2 %v578_v5  ;;  %444 = vmax.xlane.f32.xlu0 %v443_v6 }
 0x158   : > { %v469_v10 = vpop.xlane.xlu2 %468  ;;  %1037 = vmatpush.msra.mxu3 %v725_v30  ;;  %800 = vmatpush.msrb.mxu1 %v725_v30 }
 0x159   : > { %v498_v11 = vsub.f32 %v1456_v23, %v469_v10  ;;  %v499_v12 = vsub.f32 %v1459_v24, %v469_v10  ;;  %v710_v24 = vld [vmem:[%s1825_s2 + $0x38] sm:$0xff] }
 0x15a   : > { %1020 = vmatpush.msra.mxu2 %v710_v24  ;;  %743 = vmatpush.msrb.mxu0 %v710_v24 }
 0x15b   : > { %v1599_v15 = vpop.eup %1110  ;;  %v540_v17 = vmul.f32 1.442695, %v498_v11  ;;  %v542_v20 = vmul.f32 1.442695, %v499_v12  ;;  %1038 = vmatpush.msra.mxu3 %v724_v32  ;;  %801 = vmatpush.msrb.mxu1 %v724_v32 }
 0x15c   : > { %v1601_v21 = vpop.eup %1112  ;;  %1021 = vmatpush.msra.mxu2 %v709_v29  ;;  %744 = vmatpush.msrb.mxu0 %v709_v29 }
 0x15d   : > { %1114 = vpow2.f32 %v540_v17  ;;  %v581_v25 = vadd.f32 %v1601_v21, %v1599_v15  ;;  %1039 = vmatpush.msra.mxu3 %v723_v34  ;;  %802 = vmatpush.msrb.mxu1 %v723_v34 }
 0x15e   : > { %1116 = vpow2.f32 %v542_v20  ;;  %1022 = vmatpush.msra.mxu2 %v708_v31  ;;  %745 = vmatpush.msrb.mxu0 %v708_v31 }
 0x15f   : > { %582 = vadd.xlane.f32.xlu1 %v581_v25  ;;  %1040 = vmatpush.msra.mxu3 %v722_v37 }
 0x160   : > { %1023 = vmatpush.msra.mxu2 %v707_v33  ;;  %746 = vmatpush.msrb.mxu0 %v707_v33 }
 0x161   : > { %803 = vmatpush.msrb.mxu1 %v722_v37  ;;  %1041 = vmatpush.msra.mxu3 %v721_v45 }
 0x162   : > { %1024 = vmatpush.msra.mxu2 %v706_v35  ;;  %747 = vmatpush.msrb.mxu0 %v706_v35 }
 0x163   : > { %v1605_v26 = vpop.eup %1114  ;;  %804 = vmatpush.msrb.mxu1 %v721_v45  ;;  %1042 = vmatpush.msra.mxu3 %v720_v14 }
 0x164   : > { %v1607_v27 = vpop.eup %1116  ;;  %1025 = vmatpush.msra.mxu2 %v705_v42  ;;  %748 = vmatpush.msrb.mxu0 %v705_v42 }
 0x165   : > { %v584_v23 = vadd.f32 %v1607_v27, %v1605_v26  ;;  %805 = vmatpush.msrb.mxu1 %v720_v14  ;;  %1043 = vmatpush.msra.mxu3 %v719_v50 }
 0x166   : > { %1026 = vmatpush.msra.mxu2 %v704_v13  ;;  %749 = vmatpush.msrb.mxu0 %v704_v13 }
 0x167   : > { %585 = vadd.xlane.f32.xlu2 %v584_v23  ;;  %806 = vmatpush.msrb.mxu1 %v719_v50 }
 0x168   : > { %1027 = vmatpush.msra.mxu2 %v703_v48  ;;  %750 = vmatpush.msrb.mxu0 %v703_v48 }
 0x1a2   : > { %v565_v51 = vpop.xlane.xlu1 %564 }
 0x1a3   : > { %1118 = vrcp.f32 %v565_v51 }
 0x1a9   : > { %v1119_v53 = vpop.eup %1118 }
 0x1aa   : > { %v613_v54 = vmul.f32 %v1119_v53, %v565_v51  ;;  %v472_v55 = vpop.xlane.xlu1 %471  ;;  %v568_v60 = vpop.xlane.xlu0 %567 }
 0x1ab   : > { %v500_v62 = vsub.f32 %v1470_v43, %v472_v55  ;;  %v501_v63 = vsub.f32 %v1473_v44, %v472_v55  ;;  %1120 = vrcp.f32 %v568_v60 }
 0x1ac   : > { %v626_v0 = vsub.f32 2.0, %v613_v54 }
 0x1ad   : > { %v544_v40 = vmul.f32 1.442695, %v500_v62  ;;  %v546_v41 = vmul.f32 1.442695, %v501_v63 }
 0x1ae   : > { %v639_v47 = vmul.f32 %v1119_v53, %v626_v0 }
 0x1af   : > { %1122 = vpow2.f32 %v544_v40 }
 0x1b0   : > { %1124 = vpow2.f32 %v546_v41  ;;  %v653_v18 = vmul.f32 %v1463_v36, %v639_v47  ;;  %v654_v19 = vmul.f32 %v1465_v39, %v639_v47 }
 0x1b1   : > { %v1121_v5 = vpop.eup %1120 }
 0x1b2   : > { %v614_v6 = vmul.f32 %v1121_v5, %v568_v60  ;;  %v571_v10 = vpop.xlane.xlu2 %570  ;;  %679 = vst [vmem:[%s1666_s9 + $0x10] sm:$0xff] %v653_v18  ;;  %754 = vmatmul.f32.vlgmr.msra.gmra.mxu2 %v653_v18  ;;  %810 = vmatmul.f32.vlgmr.msra.gmra.mxu3 %v654_v19  ;;  %v475_v43 = vpop.xlane.xlu0 %474 }
 0x1b3   : > { %1126 = vrcp.f32 %v571_v10  ;;  %680 = vst [vmem:[%s1666_s9 + $0x18] sm:$0xff] %v654_v19  ;;  %v502_v44 = vsub.f32 %v1484_v58, %v475_v43  ;;  %v503_v11 = vsub.f32 %v1487_v59, %v475_v43 }
 0x1b4   : > { %v627_v36 = vsub.f32 2.0, %v614_v6 }
 0x1b5   : > { %v1672_v39 = vpop.eup %1122  ;;  %v548_v12 = vmul.f32 1.442695, %v502_v44  ;;  %v550_v17 = vmul.f32 1.442695, %v503_v11 }
 0x1b6   : > { %v1674_v20 = vpop.eup %1124  ;;  %v640_v25 = vmul.f32 %v1121_v5, %v627_v36 }
 0x1b7   : > { %1128 = vpow2.f32 %v548_v12  ;;  %v587_v23 = vadd.f32 %v1674_v20, %v1672_v39 }
 0x1b8   : > { %1130 = vpow2.f32 %v550_v17  ;;  %v655_v24 = vmul.f32 %v1475_v52, %v640_v25  ;;  %v656_v58 = vmul.f32 %v1479_v56, %v640_v25 }
 0x1b9   : > { %v1127_v59 = vpop.eup %1126  ;;  %588 = vadd.xlane.f32.xlu0 %v587_v23 }
 0x1ba   : > { %v615_v28 = vmul.f32 %v1127_v59, %v571_v10  ;;  %v478_v29 = vpop.xlane.xlu2 %477  ;;  %v574_v30 = vpop.xlane.xlu1 %573  ;;  %681 = vst [vmem:[%s1666_s9 + $0x20] sm:$0xff] %v655_v24  ;;  %757 = vmatmul.f32.gmra.mxu2 %v655_v24  ;;  %813 = vmatmul.f32.gmra.mxu3 %v656_v58 }
 0x1bb   : > { %v504_v31 = vsub.f32 %v1500_v3, %v478_v29  ;;  %v505_v32 = vsub.f32 %v1503_v4, %v478_v29  ;;  %1132 = vrcp.f32 %v574_v30  ;;  %682 = vst [vmem:[%s1666_s9 + $0x28] sm:$0xff] %v656_v58 }
 0x1bc   : > { %v628_v33 = vsub.f32 2.0, %v615_v28 }
 0x1bd   : > { %v1684_v34 = vpop.eup %1128  ;;  %v552_v52 = vmul.f32 1.442695, %v504_v31  ;;  %v554_v56 = vmul.f32 1.442695, %v505_v32 }
 0x1be   : > { %v1686_v35 = vpop.eup %1130  ;;  %v641_v37 = vmul.f32 %v1127_v59, %v628_v33 }
 0x1bf   : > { %1134 = vpow2.f32 %v552_v52  ;;  %v590_v42 = vadd.f32 %v1686_v35, %v1684_v34 }
 0x1c0   : > { %1136 = vpow2.f32 %v554_v56  ;;  %v657_v3 = vmul.f32 %v1491_v1, %v641_v37  ;;  %v658_v4 = vmul.f32 %v1495_v7, %v641_v37 }
 0x1c1   : > { %v1133_v45 = vpop.eup %1132  ;;  %591 = vadd.xlane.f32.xlu1 %v590_v42 }
 0x1c2   : > { %v616_v13 = vmul.f32 %v1133_v45, %v574_v30  ;;  %v481_v14 = vpop.xlane.xlu1 %480  ;;  %683 = vst [vmem:[%s1666_s9 + $0x30] sm:$0xff] %v657_v3  ;;  %760 = vmatmul.f32.gmra.mxu2 %v657_v3  ;;  %816 = vmatmul.f32.gmra.mxu3 %v658_v4  ;;  %v577_v48 = vpop.xlane.xlu0 %576 }
 0x1c3   : > { %v506_v50 = vsub.f32 %v1516_v8, %v481_v14  ;;  %v507_v51 = vsub.f32 %v1519_v9, %v481_v14  ;;  %684 = vst [vmem:[%s1666_s9 + $0x38] sm:$0xff] %v658_v4  ;;  %1138 = vrcp.f32 %v577_v48 }
 0x1c4   : > { %v629_v53 = vsub.f32 2.0, %v616_v13 }
 0x1c5   : > { %v1696_v54 = vpop.eup %1134  ;;  %v556_v1 = vmul.f32 1.442695, %v506_v50  ;;  %v558_v7 = vmul.f32 1.442695, %v507_v51 }
 0x1c6   : > { %v1698_v55 = vpop.eup %1136  ;;  %v642_v60 = vmul.f32 %v1133_v45, %v629_v53 }
 0x1c7   : > { %1140 = vpow2.f32 %v556_v1  ;;  %v593_v62 = vadd.f32 %v1698_v55, %v1696_v54 }
 0x1c8   : > { %1142 = vpow2.f32 %v558_v7  ;;  %v659_v8 = vmul.f32 %v1507_v16, %v642_v60  ;;  %v660_v9 = vmul.f32 %v1511_v22, %v642_v60 }
 0x1c9   : > { %v1139_v63 = vpop.eup %1138  ;;  %594 = vadd.xlane.f32.xlu2 %v593_v62 }
 0x1ca   : > { %v617_v0 = vmul.f32 %v1139_v63, %v577_v48  ;;  %v580_v40 = vpop.xlane.xlu2 %579  ;;  %685 = vst [vmem:[%s1666_s9 + $0x40] sm:$0xff] %v659_v8  ;;  %763 = vmatmul.f32.gmra.mxu2 %v659_v8  ;;  %819 = vmatmul.f32.gmra.mxu3 %v660_v9  ;;  %v445_v41 = vpop.xlane.xlu0 %444 }
 0x1cb   : > { %1144 = vrcp.f32 %v580_v40  ;;  %686 = vst [vmem:[%s1666_s9 + $0x48] sm:$0xff] %v660_v9  ;;  %v482_v47 = vsub.f32 %v1569_v57, %v445_v41  ;;  %v483_v18 = vsub.f32 %v1573_v61, %v445_v41 }
 0x1cc   : > { %v630_v19 = vsub.f32 2.0, %v617_v0 }
 0x1cd   : > { %v1708_v5 = vpop.eup %1140  ;;  %v508_v16 = vmul.f32 1.442695, %v482_v47  ;;  %v510_v22 = vmul.f32 1.442695, %v483_v18 }
 0x1ce   : > { %v1710_v6 = vpop.eup %1142  ;;  %v643_v10 = vmul.f32 %v1139_v63, %v630_v19 }
 0x1cf   : > { %1146 = vpow2.f32 %v508_v16  ;;  %v596_v43 = vadd.f32 %v1710_v6, %v1708_v5 }
 0x1d0   : > { %1148 = vpow2.f32 %v510_v22  ;;  %v661_v44 = vmul.f32 %v1541_v38, %v643_v10  ;;  %v662_v57 = vmul.f32 %v1551_v49, %v643_v10 }
 0x1d1   : > { %v1145_v61 = vpop.eup %1144  ;;  %597 = vadd.xlane.f32.xlu0 %v596_v43 }
 0x1d2   : > { %v618_v11 = vmul.f32 %v1145_v61, %v580_v40  ;;  %v583_v36 = vpop.xlane.xlu1 %582  ;;  %687 = vst [vmem:[%s1666_s9 + $0x50] sm:$0xff] %v661_v44  ;;  %766 = vmatmul.f32.gmra.mxu2 %v661_v44  ;;  %822 = vmatmul.f32.gmra.mxu3 %v662_v57 }
 0x1d3   : > { %1150 = vrcp.f32 %v583_v36  ;;  %688 = vst [vmem:[%s1666_s9 + $0x58] sm:$0xff] %v662_v57 }
 0x1d4   : > { %v631_v12 = vsub.f32 2.0, %v618_v11 }
 0x1d5   : > { %v1718_v17 = vpop.eup %1146 }
 0x1d6   : > { %v1720_v25 = vpop.eup %1148  ;;  %v644_v23 = vmul.f32 %v1145_v61, %v631_v12 }
 0x1d7   : > { %v560_v38 = vadd.f32 %v1720_v25, %v1718_v17 }
 0x1d8   : > { %v663_v49 = vmul.f32 %v1583_v46, %v644_v23  ;;  %v664_v24 = vmul.f32 %v1591_v2, %v644_v23 }
 0x1d9   : > { %v1151_v58 = vpop.eup %1150  ;;  %561 = vadd.xlane.f32.xlu1 %v560_v38 }
 0x1da   : > { %v619_v59 = vmul.f32 %v1151_v58, %v583_v36  ;;  %v586_v28 = vpop.xlane.xlu2 %585  ;;  %689 = vst [vmem:[%s1666_s9 + $0x60] sm:$0xff] %v663_v49  ;;  %769 = vmatmul.f32.gmra.mxu2 %v663_v49  ;;  %825 = vmatmul.f32.gmra.mxu3 %v664_v24 }
 0x1db   : > { %1152 = vrcp.f32 %v586_v28  ;;  %690 = vst [vmem:[%s1666_s9 + $0x68] sm:$0xff] %v664_v24 }
 0x1dc   : > { %v632_v29 = vsub.f32 2.0, %v619_v59 }
 0x1de   : > { %v645_v30 = vmul.f32 %v1151_v58, %v632_v29 }
 0x1e0   : > { %v665_v31 = vmul.f32 %v1599_v15, %v645_v30  ;;  %v666_v46 = vmul.f32 %v1601_v21, %v645_v30 }
 0x1e1   : > { %v1153_v2 = vpop.eup %1152 }
 0x1e2   : > { %v620_v32 = vmul.f32 %v1153_v2, %v586_v28  ;;  %691 = vst [vmem:[%s1666_s9 + $0x70] sm:$0xff] %v665_v31  ;;  %772 = vmatmul.f32.gmra.mxu2 %v665_v31  ;;  %828 = vmatmul.f32.gmra.mxu3 %v666_v46 }
 0x1e3   : > { %692 = vst [vmem:[%s1666_s9 + $0x78] sm:$0xff] %v666_v46 }
 0x1e4   : > { %v633_v33 = vsub.f32 2.0, %v620_v32 }
 0x1e6   : > { %v646_v52 = vmul.f32 %v1153_v2, %v633_v33 }
 0x1e8   : > { %v667_v56 = vmul.f32 %v1605_v26, %v646_v52  ;;  %v668_v37 = vmul.f32 %v1607_v27, %v646_v52 }
 0x1ea   : > { %693 = vst [vmem:[%s1666_s9 + $0x80] sm:$0xff] %v667_v56  ;;  %775 = vmatmul.f32.gmra.mxu2 %v667_v56  ;;  %831 = vmatmul.f32.gmra.mxu3 %v668_v37 }
 0x1eb   : > { %694 = vst [vmem:[%s1666_s9 + $0x88] sm:$0xff] %v668_v37 }
 0x22c   : > { %v589_v15 = vpop.xlane.xlu0 %588 }
 0x22d   : > { %1154 = vrcp.f32 %v589_v15 }
 0x233   : > { %v1155_v21 = vpop.eup %1154 }
 0x234   : > { %v621_v42 = vmul.f32 %v1155_v21, %v589_v15  ;;  %v592_v3 = vpop.xlane.xlu1 %591 }
 0x235   : > { %1156 = vrcp.f32 %v592_v3  ;;  %v755_v4 = vpop.f32.mrf.mxu2  ;;  %v811_v26 = vpop.f32.mrf.mxu3 }
 0x236   : > { %v634_v27 = vsub.f32 2.0, %v621_v42  ;;  %v812_v45 = vadd.f32 %v811_v26, %v755_v4 }
 0x238   : > { %848 = vst.msk [vmem:[%s1741_s15 + $0x8] sm:$0xff] %vm291_vm0, %v812_v45  ;;  %v647_v13 = vmul.f32 %v1155_v21, %v634_v27 }
 0x23a   : > { %v669_v14 = vmul.f32 %v1672_v39, %v647_v13  ;;  %v670_v48 = vmul.f32 %v1674_v20, %v647_v13 }
 0x23b   : > { %v1157_v50 = vpop.eup %1156 }
 0x23c   : > { %v622_v51 = vmul.f32 %v1157_v50, %v592_v3  ;;  %v595_v53 = vpop.xlane.xlu2 %594  ;;  %695 = vst [vmem:[%s1666_s9 + $0x90] sm:$0xff] %v669_v14  ;;  %778 = vmatmul.f32.gmra.mxu2 %v669_v14  ;;  %834 = vmatmul.f32.gmra.mxu3 %v670_v48 }
 0x23d   : > { %1158 = vrcp.f32 %v595_v53  ;;  %696 = vst [vmem:[%s1666_s9 + $0x98] sm:$0xff] %v670_v48  ;;  %v758_v1 = vpop.f32.mrf.mxu2  ;;  %v814_v7 = vpop.f32.mrf.mxu3 }
 0x23e   : > { %v635_v60 = vsub.f32 2.0, %v622_v51  ;;  %v815_v62 = vadd.f32 %v814_v7, %v758_v1 }
 0x240   : > { %849 = vst.msk [vmem:[%s1741_s15 + $0x10] sm:$0xff] %vm291_vm0, %v815_v62  ;;  %v648_v8 = vmul.f32 %v1157_v50, %v635_v60 }
 0x242   : > { %v671_v39 = vmul.f32 %v1684_v34, %v648_v8  ;;  %v672_v20 = vmul.f32 %v1686_v35, %v648_v8 }
 0x243   : > { %v1159_v9 = vpop.eup %1158 }
 0x244   : > { %v623_v63 = vmul.f32 %v1159_v9, %v595_v53  ;;  %697 = vst [vmem:[%s1666_s9 + $0xa0] sm:$0xff] %v671_v39  ;;  %781 = vmatmul.f32.gmra.mxu2 %v671_v39  ;;  %837 = vmatmul.f32.gmra.mxu3 %v672_v20  ;;  %v598_v0 = vpop.xlane.xlu0 %597 }
 0x245   : > { %698 = vst [vmem:[%s1666_s9 + $0xa8] sm:$0xff] %v672_v20  ;;  %1160 = vrcp.f32 %v598_v0  ;;  %v761_v40 = vpop.f32.mrf.mxu2  ;;  %v817_v41 = vpop.f32.mrf.mxu3 }
 0x246   : > { %v636_v47 = vsub.f32 2.0, %v623_v63  ;;  %v818_v18 = vadd.f32 %v817_v41, %v761_v40 }
 0x248   : > { %v649_v19 = vmul.f32 %v1159_v9, %v636_v47  ;;  %850 = vst.msk [vmem:[%s1741_s15 + $0x18] sm:$0xff] %vm291_vm0, %v818_v18 }
 0x24a   : > { %v673_v34 = vmul.f32 %v1696_v54, %v649_v19  ;;  %v674_v35 = vmul.f32 %v1698_v55, %v649_v19 }
 0x24b   : > { %v1161_v16 = vpop.eup %1160 }
 0x24c   : > { %v624_v22 = vmul.f32 %v1161_v16, %v598_v0  ;;  %v562_v10 = vpop.xlane.xlu1 %561  ;;  %699 = vst [vmem:[%s1666_s9 + $0xb0] sm:$0xff] %v673_v34  ;;  %784 = vmatmul.f32.gmra.mxu2 %v673_v34  ;;  %840 = vmatmul.f32.gmra.mxu3 %v674_v35 }
 0x24d   : > { %1162 = vrcp.f32 %v562_v10  ;;  %700 = vst [vmem:[%s1666_s9 + $0xb8] sm:$0xff] %v674_v35  ;;  %v764_v43 = vpop.f32.mrf.mxu2  ;;  %v820_v44 = vpop.f32.mrf.mxu3 }
 0x24e   : > { %v637_v57 = vsub.f32 2.0, %v624_v22  ;;  %v821_v61 = vadd.f32 %v820_v44, %v764_v43 }
 0x250   : > { %v650_v11 = vmul.f32 %v1161_v16, %v637_v57  ;;  %851 = vst.msk [vmem:[%s1741_s15 + $0x20] sm:$0xff] %vm291_vm0, %v821_v61 }
 0x252   : > { %v675_v54 = vmul.f32 %v1708_v5, %v650_v11  ;;  %v676_v55 = vmul.f32 %v1710_v6, %v650_v11 }
 0x253   : > { %v1163_v36 = vpop.eup %1162 }
 0x254   : > { %v612_v12 = vmul.f32 %v1163_v36, %v562_v10  ;;  %701 = vst [vmem:[%s1666_s9 + $0xc0] sm:$0xff] %v675_v54  ;;  %787 = vmatmul.f32.gmra.mxu2 %v675_v54  ;;  %843 = vmatmul.f32.gmra.mxu3 %v676_v55 }
 0x255   : > { %702 = vst [vmem:[%s1666_s9 + $0xc8] sm:$0xff] %v676_v55  ;;  %v767_v23 = vpop.f32.mrf.mxu2  ;;  %v823_v38 = vpop.f32.mrf.mxu3 }
 0x256   : > { %v625_v49 = vsub.f32 2.0, %v612_v12  ;;  %v824_v24 = vadd.f32 %v823_v38, %v767_v23 }
 0x258   : > { %v638_v58 = vmul.f32 %v1163_v36, %v625_v49  ;;  %852 = vst.msk [vmem:[%s1741_s15 + $0x28] sm:$0xff] %vm291_vm0, %v824_v24 }
 0x25a   : > { %v651_v5 = vmul.f32 %v1718_v17, %v638_v58  ;;  %v652_v6 = vmul.f32 %v1720_v25, %v638_v58 }
 0x25c   : > { %677 = vst [vmem:[%s1666_s9] sm:$0xff] %v651_v5  ;;  %751 = vmatmul.f32.vlgmr.msrb.gmra.mxu0 %v651_v5  ;;  %807 = vmatmul.f32.vlgmr.msrb.gmra.mxu1 %v652_v6 }
 0x25d   : > { %678 = vst [vmem:[%s1666_s9 + $0x8] sm:$0xff] %v652_v6  ;;  %v770_v59 = vpop.f32.mrf.mxu2  ;;  %v826_v28 = vpop.f32.mrf.mxu3 }
 0x25e   : > { %v827_v29 = vadd.f32 %v826_v28, %v770_v59 }
 0x25f   : > { %1191 = shalt.err (!%p1188_p3)
}
 0x260   : > { %s1228_s7 = smov 256   ;;  %s1229_s9 = smov 16   ;;  %853 = vst.msk [vmem:[%s1741_s15 + $0x30] sm:$0xff] %vm291_vm0, %v827_v29 }
 0x261   : > { %1045 = dma.vmem_to_hbm [thread:$0]  (%p1298_p5), %s884_s17, 3328, %s886_s23, %s866_s22, %s1228_s7, %s1228_s7, %s1229_s9  }
 0x265   : > { %v773_v17 = vpop.f32.mrf.mxu2  ;;  %v829_v25 = vpop.f32.mrf.mxu3 }
 0x266   : > { %v830_v30 = vadd.f32 %v829_v25, %v773_v17 }
 0x268   : > { %854 = vst.msk [vmem:[%s1741_s15 + $0x38] sm:$0xff] %vm291_vm0, %v830_v30 }
 0x26d   : > { %v776_v31 = vpop.f32.mrf.mxu2  ;;  %v832_v46 = vpop.f32.mrf.mxu3 }
 0x26e   : > { %v833_v2 = vadd.f32 %v832_v46, %v776_v31 }
 0x270   : > { %855 = vst.msk [vmem:[%s1741_s15 + $0x40] sm:$0xff] %vm291_vm0, %v833_v2 }
 0x2bf   : > { %v779_v32 = vpop.f32.mrf.mxu2  ;;  %v835_v33 = vpop.f32.mrf.mxu3 }
 0x2c0   : > { %v836_v52 = vadd.f32 %v835_v33, %v779_v32 }
 0x2c2   : > { %856 = vst.msk [vmem:[%s1741_s15 + $0x48] sm:$0xff] %vm291_vm0, %v836_v52 }
 0x2c7   : > { %v782_v56 = vpop.f32.mrf.mxu2  ;;  %v838_v37 = vpop.f32.mrf.mxu3 }
 0x2c8   : > { %v839_v15 = vadd.f32 %v838_v37, %v782_v56 }
 0x2ca   : > { %857 = vst.msk [vmem:[%s1741_s15 + $0x50] sm:$0xff] %vm291_vm0, %v839_v15 }
 0x2cf   : > { %v785_v21 = vpop.f32.mrf.mxu2  ;;  %v841_v42 = vpop.f32.mrf.mxu3 }
 0x2d0   : > { %v842_v3 = vadd.f32 %v841_v42, %v785_v21 }
 0x2d2   : > { %858 = vst.msk [vmem:[%s1741_s15 + $0x58] sm:$0xff] %vm291_vm0, %v842_v3 }
 0x2d7   : > { %v788_v4 = vpop.f32.mrf.mxu2  ;;  %v844_v26 = vpop.f32.mrf.mxu3 }
 0x2d8   : > { %v845_v27 = vadd.f32 %v844_v26, %v788_v4 }
 0x2d9   : > { %v752_v45 = vpop.f32.mrf.mxu0  ;;  %v808_v13 = vpop.f32.mrf.mxu1 }
 0x2da   : > { %859 = vst.msk [vmem:[%s1741_s15 + $0x60] sm:$0xff] %vm291_vm0, %v845_v27  ;;  %v809_v14 = vadd.f32 %v808_v13, %v752_v45 }
 0x2dc   : > { %847 = vst.msk [vmem:[%s1741_s15] sm:$0xff] %vm291_vm0, %v809_v14 }
 0x2dd PF: > { %p1051_p4 = scmp.ge.s32.totalorder %s1226_s21, 2  ;;  %s908_s28 = sand.u32 1, %s1214_s18  }
 0x2de   : > { %s909_s11 = scalar_lea.sflag [#allocation3], %s908_s28 }
 0x2df   : > { %p1048_p5 = pnand %p1051_p4, %p1302_p6 }
 0x2e1   : > { %p1049_p7 = pneg %p1048_p5 }
 0x2e3   : > { %1209 = dma.done.wait (%p1049_p7), %s909_s11, 3328  }
 0x2e4   : > { %1211 = vsyncadd (%p1049_p7), %s909_s11, 4294963968  ;;  %p16_p8 = scmp.ge.s32.totalorder %s1285_s24, 5   ;;  %s1831_s18 = smov %s1218_s19 }
 0x2e5   : > { %s1832_s19 = smov %s1222_s20  ;;  %s1833_s20 = smov %s1296_s27 }
 0x2e6   : > { %s1834_s21 = smov %s1285_s24  ;;  %18 = sbr.rel (!%p16_p8) target bundleno = 3 (0x3), region = 83 }
 0x2eb   :  { %915 = vsyncpa [#allocation3], 1 }
 0x2ec   :  { %917 = vsyncpa [#allocation3 + $0x1], 1 }

</bundles_post_ra>
